<compile_context>
chip_gen: v7x
topology: tpu7x:2x2x1
jax: 0.10.0
libtpu: 0.0.40
codegen_flags: <defaults>
</compile_context>

<pallas_src>
import functools

import jax
import jax.numpy as jnp
from jax.experimental import pallas as pl
from jax.experimental.pallas import tpu as pltpu


def _round_up(x, m):
    return ((x + m - 1) // m) * m


def _disc_kernel(img_ref, lab_ref, w1i_ref, w1l_ref, b1_ref,
                 w2_ref, b2_ref, w3_ref, b3_ref, o_ref):
    # ---- layer 1: Linear(784+10 -> 512) + LeakyReLU(0.2) ----
    # concat replaced by two matmuls on the split weight; accumulate in f32.
    img = img_ref[...].astype(jnp.bfloat16)
    lab = lab_ref[...].astype(jnp.bfloat16)
    h1 = (jnp.dot(img, w1i_ref[...], preferred_element_type=jnp.float32)
          + jnp.dot(lab, w1l_ref[...], preferred_element_type=jnp.float32)
          + b1_ref[...])
    h1 = jnp.where(h1 > 0, h1, 0.2 * h1)

    # ---- layer 2: Linear(512 -> 256) + LeakyReLU(0.2) ----
    h2 = jnp.dot(h1.astype(jnp.bfloat16), w2_ref[...],
                 preferred_element_type=jnp.float32) + b2_ref[...]
    h2 = jnp.where(h2 > 0, h2, 0.2 * h2)

    # ---- layer 3: Linear(256 -> 1) + Sigmoid, padded to 128 output lanes ----
    logit = jnp.dot(h2.astype(jnp.bfloat16), w3_ref[...],
                    preferred_element_type=jnp.float32) + b3_ref[...]
    o_ref[...] = jax.nn.sigmoid(logit)


@functools.partial(jax.jit, static_argnames=("block_b",))
def discriminator_forward(image, labels, params, *, block_b=1024):
    """image: (B, 784) f32, labels: (B, 10) f32 -> validity (B, 1) f32."""
    w1i, w1l, b1, w2, b2, w3, b3 = params
    image = image.astype(jnp.float32)
    labels = labels.astype(jnp.float32)

    B = image.shape[0]
    # Batch tile: large for training batches (amortizes per-step overhead and
    # keeps the MXU fed), shrunk to an 8-row sublane granule for tiny batches.
    tile_b = min(block_b, _round_up(B, 8))
    b_pad = _round_up(B, tile_b)
    if b_pad != B:
        image = jnp.pad(image, ((0, b_pad - B), (0, 0)))
        labels = jnp.pad(labels, ((0, b_pad - B), (0, 0)))

    k_img = image.shape[1]
    k_lab = labels.shape[1]
    n_out = w3.shape[1]          # 128 (lane-dense padded output)

    resident = lambda i: (0, 0)  # weights/biases: same block every grid step
    batch_tile = lambda i: (i, 0)

    out = pl.pallas_call(
        _disc_kernel,
        out_shape=jax.ShapeDtypeStruct((b_pad, n_out), jnp.float32),
        grid=(pl.cdiv(b_pad, tile_b),),
        in_specs=[
            pl.BlockSpec((tile_b, k_img), batch_tile),   # image tile (streamed)
            pl.BlockSpec((tile_b, k_lab), batch_tile),   # label tile (streamed)
            pl.BlockSpec(w1i.shape, resident),
            pl.BlockSpec(w1l.shape, resident),
            pl.BlockSpec(b1.shape, resident),
            pl.BlockSpec(w2.shape, resident),
            pl.BlockSpec(b2.shape, resident),
            pl.BlockSpec(w3.shape, resident),
            pl.BlockSpec(b3.shape, resident),
        ],
        out_specs=pl.BlockSpec((tile_b, n_out), batch_tile),
        compiler_params=pltpu.CompilerParams(
            dimension_semantics=("parallel",),
            vmem_limit_bytes=48 * 1024 * 1024,
        ),
    )(image, labels, w1i, w1l, b1, w2, b2, w3, b3)

    # Strip batch padding and the 127 dummy output lanes.
    return out[:B, :1]


def init_params(key, image_dim=28 * 28, label_dim=10):
    """nn.Linear-style U(-1/sqrt(fan_in), +) init, laid out for the kernel:
    weights stored as (in, out) bf16, W1 split into image/label parts, and the
    final layer padded to 128 output lanes (real weights in column 0)."""
    def linear(k, fan_in, fan_out):
        kw, kb = jax.random.split(k)
        bound = 1.0 / jnp.sqrt(fan_in)
        w = jax.random.uniform(kw, (fan_in, fan_out), jnp.float32, -bound, bound)
        b = jax.random.uniform(kb, (1, fan_out), jnp.float32, -bound, bound)
        return w, b

    k1, k2, k3 = jax.random.split(key, 3)
    w1, b1 = linear(k1, image_dim + label_dim, 512)
    w2, b2 = linear(k2, 512, 256)
    w3, b3 = linear(k3, 256, 1)

    w1_img = w1[:image_dim].astype(jnp.bfloat16)          # (784, 512)
    w1_lab = w1[image_dim:].astype(jnp.bfloat16)          # (10, 512)
    w2 = w2.astype(jnp.bfloat16)                          # (512, 256)
    # Pad layer 3 to 128 lanes: column 0 is the real output, rest are zeros.
    w3_pad = jnp.zeros((256, 128), jnp.float32).at[:, :1].set(w3).astype(jnp.bfloat16)
    b3_pad = jnp.zeros((1, 128), jnp.float32).at[:, :1].set(b3)

    return (w1_img, w1_lab, b1, w2, b2, w3_pad, b3_pad)


def _reference_forward(image, labels, params):
    """Pure-JAX reference using the same bf16 weights / f32 accumulation."""
    w1i, w1l, b1, w2, b2, w3, b3 = params
    h = (jnp.dot(image.astype(jnp.bfloat16), w1i, preferred_element_type=jnp.float32)
         + jnp.dot(labels.astype(jnp.bfloat16), w1l, preferred_element_type=jnp.float32)
         + b1)
    h = jnp.where(h > 0, h, 0.2 * h)
    h = jnp.dot(h.astype(jnp.bfloat16), w2, preferred_element_type=jnp.float32) + b2
    h = jnp.where(h > 0, h, 0.2 * h)
    logit = jnp.dot(h.astype(jnp.bfloat16), w3, preferred_element_type=jnp.float32) + b3
    return jax.nn.sigmoid(logit)[:, :1]


# TODO(synk): save_params/load_params are file I/O (torch.save/load) and have no
# kernel equivalent; parameter persistence is out of scope for the forward pass.


if __name__ == "__main__":
    key = jax.random.PRNGKey(0)
    k_img, k_lab, k_par = jax.random.split(key, 3)

    B, IMAGE_DIM, LABEL_DIM = 2, 28 * 28, 10
    image = jax.random.normal(k_img, (B, IMAGE_DIM), jnp.float32)
    # one-hot labels, like a cGAN conditioning vector
    lab_idx = jax.random.randint(k_lab, (B,), 0, LABEL_DIM)
    labels = jax.nn.one_hot(lab_idx, LABEL_DIM, dtype=jnp.float32)

    params = init_params(k_par, IMAGE_DIM, LABEL_DIM)

    out = discriminator_forward(image, labels, params)
    out = jax.block_until_ready(out)

    ref = _reference_forward(image, labels, params)
    assert out.shape == (B, 1), out.shape
    assert bool(jnp.all(jnp.isfinite(out))), out
    assert jnp.allclose(out, ref, atol=1e-2, rtol=1e-2), (out, ref)

    print("KERNEL_OK")
</pallas_src>

<mosaic_0001>
module attributes {stable_mosaic.version = 11 : i64} {
  func.func @_disc_kernel(%arg0: i32, %arg1: memref<8x784xf32, #tpu.memory_space<vmem>>, %arg2: memref<8x10xf32, #tpu.memory_space<vmem>>, %arg3: memref<784x512xbf16, #tpu.memory_space<vmem>>, %arg4: memref<10x512xbf16, #tpu.memory_space<vmem>>, %arg5: memref<1x512xf32, #tpu.memory_space<vmem>>, %arg6: memref<512x256xbf16, #tpu.memory_space<vmem>>, %arg7: memref<1x256xf32, #tpu.memory_space<vmem>>, %arg8: memref<256x128xbf16, #tpu.memory_space<vmem>>, %arg9: memref<1x128xf32, #tpu.memory_space<vmem>>, %arg10: memref<8x128xf32, #tpu.memory_space<vmem>>) attributes {dimension_semantics = [#tpu.dimension_semantics<parallel>], iteration_bounds = array<i64: 1>, scalar_prefetch = 0 : i64, scratch_operands = 0 : i64, tpu.core_type = #tpu.core_type<tc>, window_params = [{transform_indices = @transform_0, window_bounds = array<i64: 8, 784>}, {transform_indices = @transform_1, window_bounds = array<i64: 8, 10>}, {pipeline_mode = #tpu.pipeline_mode<synchronous>, transform_indices = @transform_2, window_bounds = array<i64: 784, 512>}, {pipeline_mode = #tpu.pipeline_mode<synchronous>, transform_indices = @transform_3, window_bounds = array<i64: 10, 512>}, {pipeline_mode = #tpu.pipeline_mode<synchronous>, transform_indices = @transform_4, window_bounds = array<i64: 1, 512>}, {pipeline_mode = #tpu.pipeline_mode<synchronous>, transform_indices = @transform_5, window_bounds = array<i64: 512, 256>}, {pipeline_mode = #tpu.pipeline_mode<synchronous>, transform_indices = @transform_6, window_bounds = array<i64: 1, 256>}, {pipeline_mode = #tpu.pipeline_mode<synchronous>, transform_indices = @transform_7, window_bounds = array<i64: 256, 128>}, {pipeline_mode = #tpu.pipeline_mode<synchronous>, transform_indices = @transform_8, window_bounds = array<i64: 1, 128>}, {transform_indices = @transform_9, window_bounds = array<i64: 8, 128>}]} {
    %c0 = arith.constant 0 : index
    %c0_0 = arith.constant 0 : index
    %0 = vector.load %arg1[%c0, %c0_0] : memref<8x784xf32, #tpu.memory_space<vmem>>, vector<8x784xf32>
    %1 = arith.truncf %0 : vector<8x784xf32> to vector<8x784xbf16>
    %c0_1 = arith.constant 0 : index
    %c0_2 = arith.constant 0 : index
    %2 = vector.load %arg2[%c0_1, %c0_2] : memref<8x10xf32, #tpu.memory_space<vmem>>, vector<8x10xf32>
    %3 = arith.truncf %2 : vector<8x10xf32> to vector<8x10xbf16>
    %c0_3 = arith.constant 0 : index
    %c0_4 = arith.constant 0 : index
    %4 = vector.load %arg3[%c0_3, %c0_4] : memref<784x512xbf16, #tpu.memory_space<vmem>>, vector<784x512xbf16>
    %cst = arith.constant dense<0.000000e+00> : vector<8x512xf32>
    %5 = tpu.matmul %1, %4, %cst {dimension_numbers = #tpu.dot_dimension_numbers<[1], [0], [0], [1], [0, 0, 1, 1], [], []>} : vector<8x784xbf16>, vector<784x512xbf16>, vector<8x512xf32> -> vector<8x512xf32>
    %c0_5 = arith.constant 0 : index
    %c0_6 = arith.constant 0 : index
    %6 = vector.load %arg4[%c0_5, %c0_6] : memref<10x512xbf16, #tpu.memory_space<vmem>>, vector<10x512xbf16>
    %cst_7 = arith.constant dense<0.000000e+00> : vector<8x512xf32>
    %7 = tpu.matmul %3, %6, %cst_7 {dimension_numbers = #tpu.dot_dimension_numbers<[1], [0], [0], [1], [0, 0, 1, 1], [], []>} : vector<8x10xbf16>, vector<10x512xbf16>, vector<8x512xf32> -> vector<8x512xf32>
    %8 = arith.addf %5, %7 : vector<8x512xf32>
    %c0_8 = arith.constant 0 : index
    %c0_9 = arith.constant 0 : index
    %9 = vector.load %arg5[%c0_8, %c0_9] : memref<1x512xf32, #tpu.memory_space<vmem>>, vector<1x512xf32>
    %10 = vector.broadcast %9 : vector<1x512xf32> to vector<8x512xf32>
    %11 = arith.addf %8, %10 : vector<8x512xf32>
    %cst_10 = arith.constant 0.000000e+00 : f32
    %12 = vector.broadcast %cst_10 : f32 to vector<8x512xf32>
    %13 = arith.cmpf ogt, %11, %12 : vector<8x512xf32>
    %cst_11 = arith.constant 2.000000e-01 : f32
    %14 = vector.broadcast %cst_11 : f32 to vector<8x512xf32>
    %15 = arith.mulf %14, %11 : vector<8x512xf32>
    %16 = arith.select %13, %11, %15 : vector<8x512xi1>, vector<8x512xf32>
    %17 = arith.truncf %16 : vector<8x512xf32> to vector<8x512xbf16>
    %c0_12 = arith.constant 0 : index
    %c0_13 = arith.constant 0 : index
    %18 = vector.load %arg6[%c0_12, %c0_13] : memref<512x256xbf16, #tpu.memory_space<vmem>>, vector<512x256xbf16>
    %cst_14 = arith.constant dense<0.000000e+00> : vector<8x256xf32>
    %19 = tpu.matmul %17, %18, %cst_14 {dimension_numbers = #tpu.dot_dimension_numbers<[1], [0], [0], [1], [0, 0, 1, 1], [], []>} : vector<8x512xbf16>, vector<512x256xbf16>, vector<8x256xf32> -> vector<8x256xf32>
    %c0_15 = arith.constant 0 : index
    %c0_16 = arith.constant 0 : index
    %20 = vector.load %arg7[%c0_15, %c0_16] : memref<1x256xf32, #tpu.memory_space<vmem>>, vector<1x256xf32>
    %21 = vector.broadcast %20 : vector<1x256xf32> to vector<8x256xf32>
    %22 = arith.addf %19, %21 : vector<8x256xf32>
    %cst_17 = arith.constant 0.000000e+00 : f32
    %23 = vector.broadcast %cst_17 : f32 to vector<8x256xf32>
    %24 = arith.cmpf ogt, %22, %23 : vector<8x256xf32>
    %cst_18 = arith.constant 2.000000e-01 : f32
    %25 = vector.broadcast %cst_18 : f32 to vector<8x256xf32>
    %26 = arith.mulf %25, %22 : vector<8x256xf32>
    %27 = arith.select %24, %22, %26 : vector<8x256xi1>, vector<8x256xf32>
    %28 = arith.truncf %27 : vector<8x256xf32> to vector<8x256xbf16>
    %c0_19 = arith.constant 0 : index
    %c0_20 = arith.constant 0 : index
    %29 = vector.load %arg8[%c0_19, %c0_20] : memref<256x128xbf16, #tpu.memory_space<vmem>>, vector<256x128xbf16>
    %cst_21 = arith.constant dense<0.000000e+00> : vector<8x128xf32>
    %30 = tpu.matmul %28, %29, %cst_21 {dimension_numbers = #tpu.dot_dimension_numbers<[1], [0], [0], [1], [0, 0, 1, 1], [], []>} : vector<8x256xbf16>, vector<256x128xbf16>, vector<8x128xf32> -> vector<8x128xf32>
    %c0_22 = arith.constant 0 : index
    %c0_23 = arith.constant 0 : index
    %31 = vector.load %arg9[%c0_22, %c0_23] : memref<1x128xf32, #tpu.memory_space<vmem>>, vector<1x128xf32>
    %32 = vector.broadcast %31 : vector<1x128xf32> to vector<8x128xf32>
    %33 = arith.addf %30, %32 : vector<8x128xf32>
    %34 = arith.negf %33 : vector<8x128xf32>
    %35 = math.exp %34 : vector<8x128xf32>
    %cst_24 = arith.constant 1.000000e+00 : f32
    %36 = vector.broadcast %cst_24 : f32 to vector<8x128xf32>
    %37 = arith.addf %36, %35 : vector<8x128xf32>
    %38 = arith.divf %36, %37 : vector<8x128xf32>
    %c0_25 = arith.constant 0 : index
    %c0_26 = arith.constant 0 : index
    %39 = vector.load %arg10[%c0_25, %c0_26] : memref<8x128xf32, #tpu.memory_space<vmem>>, vector<8x128xf32>
    tpu.vector_store %arg10[%c0_25, %c0_26], %38 {strides = array<i32>} : memref<8x128xf32, #tpu.memory_space<vmem>>, vector<8x128xf32>,
    return
  }
  func.func @transform_0(%arg0: i32) -> (i32, i32) {
    %c0_i32 = arith.constant 0 : i32
    %c0_i32_0 = arith.constant 0 : i32
    return %arg0, %c0_i32 : i32, i32
  }
  func.func @transform_1(%arg0: i32) -> (i32, i32) {
    %c0_i32 = arith.constant 0 : i32
    %c0_i32_0 = arith.constant 0 : i32
    return %arg0, %c0_i32 : i32, i32
  }
  func.func @transform_2(%arg0: i32) -> (i32, i32) {
    %c0_i32 = arith.constant 0 : i32
    %c0_i32_0 = arith.constant 0 : i32
    %c0_i32_1 = arith.constant 0 : i32
    return %c0_i32, %c0_i32_0 : i32, i32
  }
  func.func @transform_3(%arg0: i32) -> (i32, i32) {
    %c0_i32 = arith.constant 0 : i32
    %c0_i32_0 = arith.constant 0 : i32
    %c0_i32_1 = arith.constant 0 : i32
    return %c0_i32, %c0_i32_0 : i32, i32
  }
  func.func @transform_4(%arg0: i32) -> (i32, i32) {
    %c0_i32 = arith.constant 0 : i32
    %c0_i32_0 = arith.constant 0 : i32
    %c0_i32_1 = arith.constant 0 : i32
    return %c0_i32, %c0_i32_0 : i32, i32
  }
  func.func @transform_5(%arg0: i32) -> (i32, i32) {
    %c0_i32 = arith.constant 0 : i32
    %c0_i32_0 = arith.constant 0 : i32
    %c0_i32_1 = arith.constant 0 : i32
    return %c0_i32, %c0_i32_0 : i32, i32
  }
  func.func @transform_6(%arg0: i32) -> (i32, i32) {
    %c0_i32 = arith.constant 0 : i32
    %c0_i32_0 = arith.constant 0 : i32
    %c0_i32_1 = arith.constant 0 : i32
    return %c0_i32, %c0_i32_0 : i32, i32
  }
  func.func @transform_7(%arg0: i32) -> (i32, i32) {
    %c0_i32 = arith.constant 0 : i32
    %c0_i32_0 = arith.constant 0 : i32
    %c0_i32_1 = arith.constant 0 : i32
    return %c0_i32, %c0_i32_0 : i32, i32
  }
  func.func @transform_8(%arg0: i32) -> (i32, i32) {
    %c0_i32 = arith.constant 0 : i32
    %c0_i32_0 = arith.constant 0 : i32
    %c0_i32_1 = arith.constant 0 : i32
    return %c0_i32, %c0_i32_0 : i32, i32
  }
  func.func @transform_9(%arg0: i32) -> (i32, i32) {
    %c0_i32 = arith.constant 0 : i32
    %c0_i32_0 = arith.constant 0 : i32
    return %arg0, %c0_i32 : i32, i32
  }
}

</mosaic_0001>

<bundles_post_ra>
// kernel: discriminator_forward.1
= control target key start
LH: loop header
LB: loop body
LE: loop exit
PB: predicated region body
PF: predicated region fallthrough
CT: control target
= control target key end

     0   :  { %14 = vsyncpa [#allocation3], 0  ;;  %s3455_s0 = inlined_call_operand.vmem [shape: f32[8,784], index: 0, kind: input, shape index: {}]   ;;  %s3456_s1 = inlined_call_operand.vmem [shape: f32[8,10], index: 1, kind: input, shape index: {}]   ;;  %s3457_s2 = inlined_call_operand.hbm [shape: bf16[784,512], index: 2, kind: input, shape index: {}]   ;;  %s3458_s3 = inlined_call_operand.vmem [shape: bf16[10,512], index: 3, kind: input, shape index: {}]   ;;  %s3459_s4 = inlined_call_operand.vmem [shape: f32[1,512], index: 4, kind: input, shape index: {}]   ;;  %s3460_s5 = inlined_call_operand.hbm [shape: bf16[512,256], index: 5, kind: input, shape index: {}]   ;;  %s3461_s6 = inlined_call_operand.vmem [shape: f32[1,256], index: 6, kind: input, shape index: {}]   ;;  %s3462_s7 = inlined_call_operand.hbm [shape: bf16[256,128], index: 7, kind: input, shape index: {}]   ;;  %s3463_s8 = inlined_call_operand.vmem [shape: f32[1,128], index: 8, kind: input, shape index: {}]   ;;  %s3464_s9 = inlined_call_operand.vmem [shape: f32[8,128], index: 9, kind: output, shape index: {}]  }
   0x1   :  { %15 = vsyncpa [#allocation5], 0  ;;  %s3245_s30 = smov [#allocation4]   ;;  %s3175_s13 = scalar_lea.hbm %s3460_s5, 8192 }
   0x2   :  { %s41_s10 = sshll.u32 %s3245_s30, 4  ;;  %p3176_p0 = scmp.ne.s32.totalorder %s3460_s5, %s3175_s13  ;;  %s42_s10 = int_to_ptr.vmem [resolvable:$true] %s41_s10 }
   0x3   :  { %p3179_p1 = scmp.lt.u32.totalorder %s3175_s13, %s3460_s5 }
   0x5   :  { %p3181_p2 = pnand %p3179_p1, %p3176_p0 }
   0x7   :  { %3184 = shalt.err (!%p3181_p2)
}
   0x8   :  { %s3185_s18 = scalar_lea.vmem %s42_s10, 8192  ;;  %p3190_p4 = scmp.lt.s32.totalorder %s42_s10, %s42_s10 }
   0x9   :  { %p3186_p3 = scmp.ne.s32.totalorder %s42_s10, %s3185_s18  ;;  %p3191_p5 = scmp.lt.s32.totalorder %s3185_s18, %s3185_s18 }
   0xb   :  { %p3192_p6 = por %p3191_p5, %p3190_p4 }
   0xd   :  { %p3193_p7 = pnand %p3192_p6, %p3186_p3 }
   0xf   :  { %3196 = shalt.err (!%p3193_p7)
}
  0x10   :  { %s3246_s19 = smov 128   ;;  %s3247_s20 = smov 8  }
  0x11   :  { %47 = dma.hbm_to_vmem [thread:$0]  %s3460_s5, 8192, %s42_s10, [#allocation5], %s3246_s19, %s3246_s19, %s3247_s20  }
  0x12   :  { %s3248_s23 = smov [#allocation2]   ;;  %s3197_s27 = scalar_lea.hbm %s3457_s2, 25088 }
  0x13   :  { %s25_s24 = sshll.u32 %s3248_s23, 4  ;;  %p3198_p8 = scmp.ne.s32.totalorder %s3457_s2, %s3197_s27  ;;  %s26_s24 = int_to_ptr.vmem [resolvable:$true] %s25_s24 }
  0x14   :  { %p3201_p9 = scmp.lt.u32.totalorder %s3197_s27, %s3457_s2 }
  0x16   :  { %p3203_p10 = pnand %p3201_p9, %p3198_p8 }
  0x18   :  { %3206 = shalt.err (!%p3203_p10)
}
  0x19   :  { %s3207_s12 = scalar_lea.vmem %s26_s24, 25088  ;;  %p3212_p12 = scmp.lt.s32.totalorder %s26_s24, %s26_s24 }
  0x1a   :  { %p3208_p11 = scmp.ne.s32.totalorder %s26_s24, %s3207_s12  ;;  %p3213_p13 = scmp.lt.s32.totalorder %s3207_s12, %s3207_s12 }
  0x1c   :  { %p3214_p0 = por %p3213_p13, %p3212_p12 }
  0x1e   :  { %p3215_p1 = pnand %p3214_p0, %p3208_p11 }
  0x20   :  { %3218 = shalt.err (!%p3215_p1)
}
  0x21   :  { %s3249_s5 = smov 256   ;;  %s3250_s10 = smov 16  }
  0x22   :  { %31 = dma.hbm_to_vmem [thread:$0]  %s3457_s2, 25088, %s26_s24, [#allocation3], %s3249_s5, %s3249_s5, %s3250_s10  }
  0x23   :  { %s3251_s15 = smov [#allocation6]   ;;  %s3219_s19 = scalar_lea.hbm %s3462_s7, 2048 }
  0x24   :  { %s55_s16 = sshll.u32 %s3251_s15, 4  ;;  %p3220_p2 = scmp.ne.s32.totalorder %s3462_s7, %s3219_s19  ;;  %s56_s16 = int_to_ptr.vmem [resolvable:$true] %s55_s16 }
  0x25   :  { %p3223_p3 = scmp.lt.u32.totalorder %s3219_s19, %s3462_s7 }
  0x27   :  { %p3225_p4 = pnand %p3223_p3, %p3220_p2 }
  0x29   :  { %3228 = shalt.err (!%p3225_p4)
}
  0x2a   :  { %s3229_s25 = scalar_lea.vmem %s56_s16, 2048  ;;  %p3234_p6 = scmp.lt.s32.totalorder %s56_s16, %s56_s16 }
  0x2b   :  { %p3230_p5 = scmp.ne.s32.totalorder %s56_s16, %s3229_s25  ;;  %p3235_p7 = scmp.lt.s32.totalorder %s3229_s25, %s3229_s25 }
  0x2d   :  { %p3236_p8 = por %p3235_p7, %p3234_p6 }
  0x2f   :  { %p3237_p9 = pnand %p3236_p8, %p3230_p5 }
  0x31   :  { %3240 = shalt.err (!%p3237_p9)
}
  0x32   :  { %s3252_s2 = smov 64   ;;  %s3253_s24 = smov 4  }
  0x33   :  { %61 = dma.hbm_to_vmem [thread:$0]  %s3462_s7, 2048, %s56_s16, [#allocation5], %s3252_s2, %s3252_s2, %s3253_s24  }
  0x34   :  { %3241 = dma.done.wait [#allocation3], 25088  }
  0x35   :  { %3242 = vsyncadd [#allocation3], 4294942208 }
  0x36   :  { %3243 = dma.done.wait [#allocation5], 10240  }
  0x37   :  { %3244 = vsyncadd [#allocation5], 4294957056  ;;  %v3254_v0 = vmov 0   ;;  %v2759_v1 = vld [vmem:[#allocation2 + $0x4] ss:$16 sps:$4 sm:$0xff]   ;;  %vm310_vm0 = vcmask 1044480  }
  0x38   :  { %355 = vmatprep.mubr.bf16.mxu0 %v3254_v0  ;;  %v2761_v2 = vld [vmem:[#allocation2] ss:$16 sps:$4 sm:$0xff]   ;;  %1389 = vmatprep.subr.bf16.mxu1 %v2759_v1  ;;  %v2762_v3 = vld [vmem:[#allocation2 + $0x24] ss:$16 sps:$4 sm:$0xff]   ;;  %vm306_vm1 = vcmask 80896   ;;  %v75_v25 = vld [vmem:[%s3455_s0 + $0x8] sm:$0xff] }
  0x39   :  { %1390 = vmatpush1.bf16.msra.mxu1 %v2761_v2  ;;  %v2764_v4 = vld [vmem:[#allocation2 + $0x20] ss:$16 sps:$4 sm:$0xff]   ;;  %v2765_v5 = vld [vmem:[#allocation2 + $0x44] ss:$16 sps:$4 sm:$0xff]   ;;  %v3366_v27 = vpack.c.bf16 %v75_v25, %v75_v25  ;;  %vm1385_vm2 = vcmask 130048  }
  0x3a   :  { %1391 = vmatprep.subr.bf16.mxu1 %v2762_v3  ;;  %v2767_v6 = vld [vmem:[#allocation2 + $0x40] ss:$16 sps:$4 sm:$0xff]   ;;  %v2768_v7 = vld [vmem:[#allocation2 + $0x64] ss:$16 sps:$4 sm:$0xff]  }
  0x3b   :  { %v2770_v8 = vld [vmem:[#allocation2 + $0x60] ss:$16 sps:$4 sm:$0xff]   ;;  %v2771_v9 = vld [vmem:[#allocation2 + $0x84] ss:$16 sps:$4 sm:$0xff]   ;;  %1421 = vmatprep.mubr.bf16.mxu1 %v3366_v27 }
  0x3c   :  { %v2773_v10 = vld [vmem:[#allocation2 + $0x80] ss:$16 sps:$4 sm:$0xff]   ;;  %v2774_v11 = vld [vmem:[#allocation2 + $0xa4] ss:$16 sps:$4 sm:$0xff]  }
  0x3d   :  { %1392 = vmatpush1.bf16.msra.mxu1 %v2764_v4  ;;  %v2795_v12 = vld [vmem:[%s3458_s3 + $0x4] ss:$16 sps:$4 sm:$0x1f]   ;;  %v2799_v13 = vld [vmem:[%s3458_s3] ss:$16 sps:$4 sm:$0x1f]  }
  0x3e   :  { %1393 = vmatprep.subr.bf16.mxu1 %v2765_v5  ;;  %2437 = vmatprep.subr.msk.bf16.mxu0 %vm310_vm0, %v2795_v12  ;;  %v88_v14 = vld [vmem:[%s3456_s1] sm:$0xff]  ;;  %v312_v17 = vsel %vm310_vm0, %v2799_v13, 0  ;;  %v2804_v19 = vld [vmem:[%s3458_s3 + $0xc] ss:$16 sps:$4 sm:$0x1f]  }
  0x3f   :  { %v2776_v15 = vld [vmem:[#allocation2 + $0xa0] ss:$16 sps:$4 sm:$0xff]   ;;  %v2777_v16 = vld [vmem:[#allocation2 + $0xc4] ss:$16 sps:$4 sm:$0xff]   ;;  %v89_v18 = vpack.c.bf16 %v88_v14, %v88_v14  ;;  %324 = vmatpush1.bf16.msra.mxu0 %v312_v17  ;;  %v77_v12 = vld [vmem:[%s3455_s0 + $0x18] sm:$0xff] }
  0x40   :  { %v2806_v20 = vld [vmem:[%s3458_s3 + $0x8] ss:$16 sps:$4 sm:$0x1f]   ;;  %v2779_v21 = vld [vmem:[#allocation2 + $0xc0] ss:$16 sps:$4 sm:$0xff]   ;;  %2439 = vmatprep.subr.msk.bf16.mxu0 %vm310_vm0, %v2804_v19  ;;  %v3385_v14 = vpack.c.bf16 %v77_v12, %v77_v12 }
  0x41   :  { %1394 = vmatpush1.bf16.msra.mxu1 %v2767_v6  ;;  %v318_v22 = vsel %vm310_vm0, %v2806_v20, 0  ;;  %v2780_v23 = vld [vmem:[#allocation2 + $0xe4] ss:$16 sps:$4 sm:$0xff]   ;;  %v2782_v26 = vld [vmem:[#allocation2 + $0xe0] ss:$16 sps:$4 sm:$0xff]   ;;  %v79_v6 = vld [vmem:[%s3455_s0 + $0x28] sm:$0xff] }
  0x42   :  { %1395 = vmatprep.subr.bf16.mxu1 %v2768_v7  ;;  %2438 = vmatmul.mubr.msk.bf16.vlgmr.msra.gmra.mrb[0].mxu0 %vm306_vm1, %v89_v18  ;;  %v2812_v24 = vld [vmem:[#allocation2 + $0x404] ss:$16 sps:$4 sm:$0xff]   ;;  %v2810_v29 = vld [vmem:[#allocation2 + $0x400] ss:$16 sps:$4 sm:$0xff]  }
  0x43   :  { %365 = vmatpush1.bf16.msra.mxu0 %v318_v22  ;;  %396 = vmatprep.mubr.bf16.mxu0 %v3254_v0  ;;  %v2783_v28 = vld [vmem:[#allocation2 + $0x104] ss:$16 sps:$4 sm:$0xff]   ;;  %v2785_v31 = vld [vmem:[#allocation2 + $0x100] ss:$16 sps:$4 sm:$0xff]  }
  0x44   :  { %1471 = vmatprep.subr.bf16.mxu0 %v2812_v24  ;;  %v2818_v30 = vld [vmem:[#allocation2 + $0x424] ss:$16 sps:$4 sm:$0xff]   ;;  %v2816_v33 = vld [vmem:[#allocation2 + $0x420] ss:$16 sps:$4 sm:$0xff]  }
  0x45   :  { %1396 = vmatpush1.bf16.msra.mxu1 %v2770_v8  ;;  %v2786_v32 = vld [vmem:[#allocation2 + $0x124] ss:$16 sps:$4 sm:$0xff]   ;;  %v2788_v35 = vld [vmem:[#allocation2 + $0x120] ss:$16 sps:$4 sm:$0xff]   ;;  %v3379_v8 = vpack.c.bf16 %v79_v6, %v79_v6 }
  0x46   :  { %1397 = vmatprep.subr.bf16.mxu1 %v2771_v9  ;;  %v2824_v34 = vld [vmem:[#allocation2 + $0x444] ss:$16 sps:$4 sm:$0xff]   ;;  %v2822_v37 = vld [vmem:[#allocation2 + $0x440] ss:$16 sps:$4 sm:$0xff]  }
  0x47   :  { %v2789_v36 = vld [vmem:[#allocation2 + $0x144] ss:$16 sps:$4 sm:$0xff]   ;;  %v2791_v39 = vld [vmem:[#allocation2 + $0x140] ss:$16 sps:$4 sm:$0xff]  }
  0x48   :  { %v2830_v38 = vld [vmem:[#allocation2 + $0x464] ss:$16 sps:$4 sm:$0xff]   ;;  %v2828_v41 = vld [vmem:[#allocation2 + $0x460] ss:$16 sps:$4 sm:$0xff]  }
  0x49   :  { %1398 = vmatpush1.bf16.msra.mxu1 %v2773_v10  ;;  %v2792_v40 = vld [vmem:[#allocation2 + $0x164] ss:$16 sps:$4 sm:$0xff]   ;;  %v2794_v43 = vld [vmem:[#allocation2 + $0x160] ss:$16 sps:$4 sm:$0xff]  }
  0x4a   :  { %1399 = vmatprep.subr.bf16.mxu1 %v2774_v11  ;;  %2440 = vmatmul.mubr.msk.bf16.vlgmr.msra.gmra.mrb[4].mxu0 %vm306_vm1, %v89_v18  ;;  %v2836_v42 = vld [vmem:[#allocation2 + $0x484] ss:$16 sps:$4 sm:$0xff]   ;;  %v2834_v45 = vld [vmem:[#allocation2 + $0x480] ss:$16 sps:$4 sm:$0xff]  }
  0x4b   :  { %1472 = vmatpush1.bf16.msra.mxu0 %v2810_v29  ;;  %v2797_v44 = vld [vmem:[#allocation2 + $0x184] ss:$16 sps:$4 sm:$0xff]   ;;  %v2800_v47 = vld [vmem:[#allocation2 + $0x180] ss:$16 sps:$4 sm:$0xff]   ;;  %1503 = vmatprep.mubr.bf16.mxu0 %v3379_v8 }
  0x4c   :  { %1473 = vmatprep.subr.bf16.mxu0 %v2818_v30  ;;  %v2842_v46 = vld [vmem:[#allocation2 + $0x4a4] ss:$16 sps:$4 sm:$0xff]   ;;  %v2840_v49 = vld [vmem:[#allocation2 + $0x4a0] ss:$16 sps:$4 sm:$0xff]  }
  0x4d   :  { %1400 = vmatpush1.bf16.msra.mxu1 %v2776_v15  ;;  %v2801_v48 = vld [vmem:[#allocation2 + $0x1a4] ss:$16 sps:$4 sm:$0xff]   ;;  %v2803_v51 = vld [vmem:[#allocation2 + $0x1a0] ss:$16 sps:$4 sm:$0xff]  }
  0x4e   :  { %1401 = vmatprep.subr.bf16.mxu1 %v2777_v16  ;;  %v2848_v50 = vld [vmem:[#allocation2 + $0x4c4] ss:$16 sps:$4 sm:$0xff]   ;;  %v2846_v53 = vld [vmem:[#allocation2 + $0x4c0] ss:$16 sps:$4 sm:$0xff]  }
  0x4f   :  { %1474 = vmatpush1.bf16.msra.mxu0 %v2816_v33  ;;  %v2807_v52 = vld [vmem:[#allocation2 + $0x1c4] ss:$16 sps:$4 sm:$0xff]   ;;  %v2809_v55 = vld [vmem:[#allocation2 + $0x1c0] ss:$16 sps:$4 sm:$0xff]  }
  0x50   :  { %1475 = vmatprep.subr.bf16.mxu0 %v2824_v34  ;;  %v2854_v54 = vld [vmem:[#allocation2 + $0x4e4] ss:$16 sps:$4 sm:$0xff]   ;;  %v2852_v57 = vld [vmem:[#allocation2 + $0x4e0] ss:$16 sps:$4 sm:$0xff]  }
  0x51   :  { %1402 = vmatpush1.bf16.msra.mxu1 %v2779_v21  ;;  %v2813_v56 = vld [vmem:[#allocation2 + $0x1e4] ss:$16 sps:$4 sm:$0xff]   ;;  %v2815_v59 = vld [vmem:[#allocation2 + $0x1e0] ss:$16 sps:$4 sm:$0xff]  }
  0x52   :  { %1403 = vmatprep.subr.bf16.mxu1 %v2780_v23  ;;  %v2860_v58 = vld [vmem:[#allocation2 + $0x504] ss:$16 sps:$4 sm:$0xff]   ;;  %v2858_v62 = vld [vmem:[#allocation2 + $0x500] ss:$16 sps:$4 sm:$0xff]  }
  0x53   :  { %1476 = vmatpush1.bf16.msra.mxu0 %v2822_v37  ;;  %v74_v60 = vld [vmem:[%s3455_s0] sm:$0xff] }
  0x54   :  { %1477 = vmatprep.subr.bf16.mxu0 %v2830_v38  ;;  %v2821_v61 = vld [vmem:[#allocation2 + $0x204] ss:$16 sps:$4 sm:$0xff]   ;;  %v3373_v63 = vpack.c.bf16 %v74_v60, %v74_v60  ;;  %v2819_v2 = vld [vmem:[#allocation2 + $0x200] ss:$16 sps:$4 sm:$0xff]   ;;  %v2941_v60 = vld [vmem:[#allocation2 + $0x28c] ss:$16 sps:$4 sm:$0xff]  }
  0x55   :  { %1404 = vmatpush1.bf16.msra.mxu1 %v2782_v26  ;;  %v2866_v1 = vld [vmem:[#allocation2 + $0x524] ss:$16 sps:$4 sm:$0xff]   ;;  %v2864_v4 = vld [vmem:[#allocation2 + $0x520] ss:$16 sps:$4 sm:$0xff]  }
  0x56   :  { %1405 = vmatprep.subr.bf16.mxu1 %v2783_v28  ;;  %v2827_v3 = vld [vmem:[#allocation2 + $0x224] ss:$16 sps:$4 sm:$0xff]   ;;  %v2825_v7 = vld [vmem:[#allocation2 + $0x220] ss:$16 sps:$4 sm:$0xff]  }
  0x57   :  { %1478 = vmatpush1.bf16.msra.mxu0 %v2828_v41  ;;  %v2872_v5 = vld [vmem:[#allocation2 + $0x544] ss:$16 sps:$4 sm:$0xff]   ;;  %v2870_v10 = vld [vmem:[#allocation2 + $0x540] ss:$16 sps:$4 sm:$0xff]  }
  0x58   :  { %1479 = vmatprep.subr.bf16.mxu0 %v2836_v42  ;;  %v2833_v9 = vld [vmem:[#allocation2 + $0x244] ss:$16 sps:$4 sm:$0xff]   ;;  %v2831_v13 = vld [vmem:[#allocation2 + $0x240] ss:$16 sps:$4 sm:$0xff]  }
  0x59   :  { %1406 = vmatpush1.bf16.msra.mxu1 %v2785_v31  ;;  %v2878_v11 = vld [vmem:[#allocation2 + $0x564] ss:$16 sps:$4 sm:$0xff]   ;;  %v2876_v16 = vld [vmem:[#allocation2 + $0x560] ss:$16 sps:$4 sm:$0xff]  }
  0x5a   :  { %1407 = vmatprep.subr.bf16.mxu1 %v2786_v32  ;;  %v2839_v15 = vld [vmem:[#allocation2 + $0x264] ss:$16 sps:$4 sm:$0xff]   ;;  %v2837_v18 = vld [vmem:[#allocation2 + $0x260] ss:$16 sps:$4 sm:$0xff]  }
  0x5b   :  { %1480 = vmatpush1.bf16.msra.mxu0 %v2834_v45  ;;  %v2884_v17 = vld [vmem:[#allocation2 + $0x584] ss:$16 sps:$4 sm:$0xff]   ;;  %v2882_v20 = vld [vmem:[#allocation2 + $0x580] ss:$16 sps:$4 sm:$0xff]  }
  0x5c   :  { %1481 = vmatprep.subr.bf16.mxu0 %v2842_v46  ;;  %v2845_v19 = vld [vmem:[#allocation2 + $0x284] ss:$16 sps:$4 sm:$0xff]   ;;  %v2843_v22 = vld [vmem:[#allocation2 + $0x280] ss:$16 sps:$4 sm:$0xff]  }
  0x5d   :  { %1408 = vmatpush1.bf16.msra.mxu1 %v2788_v35  ;;  %v2890_v21 = vld [vmem:[#allocation2 + $0x5a4] ss:$16 sps:$4 sm:$0xff]   ;;  %v2888_v24 = vld [vmem:[#allocation2 + $0x5a0] ss:$16 sps:$4 sm:$0xff]  }
  0x5e   :  { %1409 = vmatprep.subr.bf16.mxu1 %v2789_v36  ;;  %v2851_v23 = vld [vmem:[#allocation2 + $0x2a4] ss:$16 sps:$4 sm:$0xff]   ;;  %v2849_v26 = vld [vmem:[#allocation2 + $0x2a0] ss:$16 sps:$4 sm:$0xff]  }
  0x5f   :  { %1482 = vmatpush1.bf16.msra.mxu0 %v2840_v49  ;;  %v2896_v25 = vld [vmem:[#allocation2 + $0x5c4] ss:$16 sps:$4 sm:$0xff]   ;;  %v2894_v29 = vld [vmem:[#allocation2 + $0x5c0] ss:$16 sps:$4 sm:$0xff]  }
  0x60   :  { %1483 = vmatprep.subr.bf16.mxu0 %v2848_v50  ;;  %v2857_v28 = vld [vmem:[#allocation2 + $0x2c4] ss:$16 sps:$4 sm:$0xff]   ;;  %v2855_v31 = vld [vmem:[#allocation2 + $0x2c0] ss:$16 sps:$4 sm:$0xff]  }
  0x61   :  { %1410 = vmatpush1.bf16.msra.mxu1 %v2791_v39  ;;  %v2902_v30 = vld [vmem:[#allocation2 + $0x5e4] ss:$16 sps:$4 sm:$0xff]   ;;  %v2900_v33 = vld [vmem:[#allocation2 + $0x5e0] ss:$16 sps:$4 sm:$0xff]  }
  0x62   :  { %1411 = vmatprep.subr.bf16.mxu1 %v2792_v40  ;;  %v2863_v32 = vld [vmem:[#allocation2 + $0x2e4] ss:$16 sps:$4 sm:$0xff]   ;;  %v2861_v36 = vld [vmem:[#allocation2 + $0x2e0] ss:$16 sps:$4 sm:$0xff]   ;;  %v2917_v40 = vld [vmem:[#allocation2 + $0x20c] ss:$16 sps:$4 sm:$0xff]  }
  0x63   :  { %1484 = vmatpush1.bf16.msra.mxu0 %v2846_v53  ;;  %v78_v34 = vld [vmem:[%s3455_s0 + $0x20] sm:$0xff] }
  0x64   :  { %1485 = vmatprep.subr.bf16.mxu0 %v2854_v54  ;;  %v2911_v35 = vld [vmem:[#allocation2 + $0x604] ss:$16 sps:$4 sm:$0xff]   ;;  %v3391_v38 = vpack.c.bf16 %v78_v34, %v78_v34  ;;  %v2909_v39 = vld [vmem:[#allocation2 + $0x600] ss:$16 sps:$4 sm:$0xff]   ;;  %v2942_v34 = vld [vmem:[#allocation2 + $0xa8] ss:$16 sps:$4 sm:$0xff]  }
  0x65   :  { %1412 = vmatpush1.bf16.msra.mxu1 %v2794_v43  ;;  %v2869_v37 = vld [vmem:[#allocation2 + $0x304] ss:$16 sps:$4 sm:$0xff]   ;;  %v2867_v41 = vld [vmem:[#allocation2 + $0x300] ss:$16 sps:$4 sm:$0xff]  }
  0x66   :  { %1413 = vmatprep.subr.bf16.mxu1 %v2797_v44  ;;  %v2875_v42 = vld [vmem:[#allocation2 + $0x324] ss:$16 sps:$4 sm:$0xff]   ;;  %v2873_v44 = vld [vmem:[#allocation2 + $0x320] ss:$16 sps:$4 sm:$0xff]  }
  0x67   :  { %1486 = vmatpush1.bf16.msra.mxu0 %v2852_v57  ;;  %v80_v43 = vld [vmem:[%s3455_s0 + $0x30] sm:$0xff] }
  0x68   :  { %1487 = vmatprep.subr.bf16.mxu0 %v2860_v58  ;;  %v2881_v45 = vld [vmem:[#allocation2 + $0x344] ss:$16 sps:$4 sm:$0xff]   ;;  %v3398_v46 = vpack.c.bf16 %v80_v43, %v80_v43  ;;  %v2879_v49 = vld [vmem:[#allocation2 + $0x340] ss:$16 sps:$4 sm:$0xff]   ;;  %v2954_v43 = vld [vmem:[#allocation2 + $0xe8] ss:$16 sps:$4 sm:$0xff]  }
  0x69   :  { %1414 = vmatpush1.bf16.msra.mxu1 %v2800_v47  ;;  %v2915_v47 = vld [vmem:[#allocation2 + $0x208] ss:$16 sps:$4 sm:$0xff]   ;;  %v2887_v50 = vld [vmem:[#allocation2 + $0x364] ss:$16 sps:$4 sm:$0xff]   ;;  %v2885_v53 = vld [vmem:[#allocation2 + $0x360] ss:$16 sps:$4 sm:$0xff]  }
  0x6a   :  { %1415 = vmatprep.subr.bf16.mxu1 %v2801_v48  ;;  %v2923_v48 = vld [vmem:[#allocation2 + $0x22c] ss:$16 sps:$4 sm:$0xff]   ;;  %v2893_v54 = vld [vmem:[#allocation2 + $0x384] ss:$16 sps:$4 sm:$0xff]   ;;  %v2891_v57 = vld [vmem:[#allocation2 + $0x380] ss:$16 sps:$4 sm:$0xff]  }
  0x6b   :  { %1488 = vmatpush1.bf16.msra.mxu0 %v2858_v62  ;;  %v2899_v58 = vld [vmem:[#allocation2 + $0x3a4] ss:$16 sps:$4 sm:$0xff]   ;;  %v2906_v6 = vld [vmem:[#allocation2 + $0x3e0] ss:$16 sps:$4 sm:$0xff]  }
  0x6c   :  { %1489 = vmatprep.subr.bf16.mxu0 %v2866_v1  ;;  %v2905_v62 = vld [vmem:[#allocation2 + $0x3c4] ss:$16 sps:$4 sm:$0xff]   ;;  %v2939_v1 = vld [vmem:[#allocation2 + $0x288] ss:$16 sps:$4 sm:$0xff]  }
  0x6d   :  { %1416 = vmatpush1.bf16.msra.mxu1 %v2803_v51  ;;  %v2921_v51 = vld [vmem:[#allocation2 + $0x228] ss:$16 sps:$4 sm:$0xff]  }
  0x6e   :  { %1417 = vmatprep.subr.bf16.mxu1 %v2807_v52  ;;  %v2929_v52 = vld [vmem:[#allocation2 + $0x24c] ss:$16 sps:$4 sm:$0xff]  }
  0x6f   :  { %1490 = vmatpush1.bf16.msra.mxu0 %v2864_v4  ;;  %v2908_v4 = vld [vmem:[#allocation2 + $0x3e4] ss:$16 sps:$4 sm:$0xff]  }
  0x70   :  { %1491 = vmatprep.subr.bf16.mxu0 %v2872_v5  ;;  %v2945_v5 = vld [vmem:[#allocation2 + $0x2a8] ss:$16 sps:$4 sm:$0xff]  }
  0x71   :  { %1418 = vmatpush1.bf16.msra.mxu1 %v2809_v55  ;;  %v2927_v55 = vld [vmem:[#allocation2 + $0x248] ss:$16 sps:$4 sm:$0xff]  }
  0x72   :  { %1419 = vmatprep.subr.bf16.mxu1 %v2813_v56  ;;  %v2935_v56 = vld [vmem:[#allocation2 + $0x26c] ss:$16 sps:$4 sm:$0xff]  }
  0x73   :  { %1492 = vmatpush1.bf16.msra.mxu0 %v2870_v10  ;;  %v2914_v10 = vld [vmem:[#allocation2 + $0xc] ss:$16 sps:$4 sm:$0xff]  }
  0x74   :  { %1493 = vmatprep.subr.bf16.mxu0 %v2878_v11  ;;  %v2951_v11 = vld [vmem:[#allocation2 + $0x2c8] ss:$16 sps:$4 sm:$0xff]  }
  0x75   :  { %1420 = vmatpush1.bf16.msra.mxu1 %v2815_v59  ;;  %v2933_v59 = vld [vmem:[#allocation2 + $0x268] ss:$16 sps:$4 sm:$0xff]  }
  0x76   :  { %1430 = vmatprep.subr.bf16.mxu1 %v2821_v61  ;;  %v2897_v61 = vld [vmem:[#allocation2 + $0x3a0] ss:$16 sps:$4 sm:$0xff]  }
  0x77   :  { %1494 = vmatpush1.bf16.msra.mxu0 %v2876_v16  ;;  %v2957_v16 = vld [vmem:[#allocation2 + $0x2e8] ss:$16 sps:$4 sm:$0xff]  }
  0x78   :  { %1422 = vmatmul.mubr.bf16.vlgmr.msra.gmra.mrb[0].mxu1 %v3373_v63  ;;  %1495 = vmatprep.subr.bf16.mxu0 %v2884_v17  ;;  %v2965_v17 = vld [vmem:[#allocation2 + $0x30c] ss:$16 sps:$4 sm:$0xff]  }
  0x79   :  { %1431 = vmatpush1.bf16.msra.mxu1 %v2819_v2  ;;  %1462 = vmatprep.mubr.bf16.mxu1 %v3385_v14  ;;  %v2947_v2 = vld [vmem:[#allocation2 + $0x2ac] ss:$16 sps:$4 sm:$0xff]  }
  0x7a   :  { %1432 = vmatprep.subr.bf16.mxu1 %v2827_v3  ;;  %v2903_v3 = vld [vmem:[#allocation2 + $0x3c0] ss:$16 sps:$4 sm:$0xff]  }
  0x7b   :  { %1496 = vmatpush1.bf16.msra.mxu0 %v2882_v20  ;;  %v2924_v20 = vld [vmem:[#allocation2 + $0x48] ss:$16 sps:$4 sm:$0xff]  }
  0x7c   :  { %1497 = vmatprep.subr.bf16.mxu0 %v2890_v21  ;;  %v2963_v21 = vld [vmem:[#allocation2 + $0x308] ss:$16 sps:$4 sm:$0xff]  }
  0x7d   :  { %1433 = vmatpush1.bf16.msra.mxu1 %v2825_v7  ;;  %v2953_v7 = vld [vmem:[#allocation2 + $0x2cc] ss:$16 sps:$4 sm:$0xff]  }
  0x7e   :  { %1434 = vmatprep.subr.bf16.mxu1 %v2833_v9  ;;  %v76_v9 = vld [vmem:[%s3455_s0 + $0x10] sm:$0xff] }
  0x7f   :  { %1498 = vmatpush1.bf16.msra.mxu0 %v2888_v24  ;;  %v3406_v12 = vpack.c.bf16 %v76_v9, %v76_v9  ;;  %v2969_v24 = vld [vmem:[#allocation2 + $0x328] ss:$16 sps:$4 sm:$0xff]   ;;  %v3004_v9 = vld [vmem:[#allocation2 + $0x1ec] ss:$16 sps:$4 sm:$0xff]  }
  0x80   :  { %1499 = vmatprep.subr.bf16.mxu0 %v2896_v25  ;;  %v2977_v25 = vld [vmem:[#allocation2 + $0x34c] ss:$16 sps:$4 sm:$0xff]  }
  0x81   :  { %1435 = vmatpush1.bf16.msra.mxu1 %v2831_v13  ;;  %v2959_v13 = vld [vmem:[#allocation2 + $0x2ec] ss:$16 sps:$4 sm:$0xff]  }
  0x82   :  { %1436 = vmatprep.subr.bf16.mxu1 %v2839_v15  ;;  %v2920_v15 = vld [vmem:[#allocation2 + $0x2c] ss:$16 sps:$4 sm:$0xff]  }
  0x83   :  { %1500 = vmatpush1.bf16.msra.mxu0 %v2894_v29  ;;  %v2975_v29 = vld [vmem:[#allocation2 + $0x348] ss:$16 sps:$4 sm:$0xff]  }
  0x84   :  { %1501 = vmatprep.subr.bf16.mxu0 %v2902_v30  ;;  %v2936_v30 = vld [vmem:[#allocation2 + $0x88] ss:$16 sps:$4 sm:$0xff]  }
  0x85   :  { %1437 = vmatpush1.bf16.msra.mxu1 %v2837_v18  ;;  %v2918_v18 = vld [vmem:[#allocation2 + $0x28] ss:$16 sps:$4 sm:$0xff]  }
  0x86   :  { %1438 = vmatprep.subr.bf16.mxu1 %v2845_v19  ;;  %v2926_v19 = vld [vmem:[#allocation2 + $0x4c] ss:$16 sps:$4 sm:$0xff]  }
  0x87   :  { %1502 = vmatpush1.bf16.msra.mxu0 %v2900_v33  ;;  %v2989_v33 = vld [vmem:[#allocation2 + $0x38c] ss:$16 sps:$4 sm:$0xff]  }
  0x88   :  { %1512 = vmatprep.subr.bf16.mxu0 %v2911_v35  ;;  %v2950_v35 = vld [vmem:[#allocation2 + $0xcc] ss:$16 sps:$4 sm:$0xff]  }
  0x89   :  { %1439 = vmatpush1.bf16.msra.mxu1 %v2843_v22  ;;  %v2932_v22 = vld [vmem:[#allocation2 + $0x6c] ss:$16 sps:$4 sm:$0xff]  }
  0x8a   :  { %1440 = vmatprep.subr.bf16.mxu1 %v2851_v23  ;;  %1504 = vmatmul.mubr.bf16.vlgmr.msra.gmra.mrb[8].mxu0 %v3391_v38  ;;  %v2971_v23 = vld [vmem:[#allocation2 + $0x32c] ss:$16 sps:$4 sm:$0xff]  }
  0x8b   :  { %1513 = vmatpush1.bf16.msra.mxu0 %v2909_v39  ;;  %1544 = vmatprep.mubr.bf16.mxu0 %v3254_v0  ;;  %v2948_v39 = vld [vmem:[#allocation2 + $0xc8] ss:$16 sps:$4 sm:$0xff]  }
  0x8c   :  { %1594 = vmatprep.subr.bf16.mxu0 %v2917_v40  ;;  %v2956_v40 = vld [vmem:[#allocation2 + $0xec] ss:$16 sps:$4 sm:$0xff]  }
  0x8d   :  { %1441 = vmatpush1.bf16.msra.mxu1 %v2849_v26  ;;  %v2930_v26 = vld [vmem:[#allocation2 + $0x68] ss:$16 sps:$4 sm:$0xff]  }
  0x8e   :  { %1442 = vmatprep.subr.bf16.mxu1 %v2857_v28  ;;  %v2938_v28 = vld [vmem:[#allocation2 + $0x8c] ss:$16 sps:$4 sm:$0xff]  }
  0x91   :  { %1443 = vmatpush1.bf16.msra.mxu1 %v2855_v31  ;;  %v2944_v31 = vld [vmem:[#allocation2 + $0xac] ss:$16 sps:$4 sm:$0xff]  }
  0x92   :  { %1444 = vmatprep.subr.bf16.mxu1 %v2863_v32  ;;  %2637 = vmatmul.mubr.msk.bf16.vlgmr.msra.gmra.mrb[12].mxu0 %vm1385_vm2, %v3398_v46  ;;  %v2981_v32 = vld [vmem:[#allocation2 + $0x368] ss:$16 sps:$4 sm:$0xff]  }
  0x93   :  { %1595 = vmatpush1.bf16.msra.mxu0 %v2915_v47  ;;  %1626 = vmatprep.mubr.bf16.mxu0 %v3385_v14  ;;  %v2912_v14 = vld [vmem:[#allocation2 + $0x8] ss:$16 sps:$4 sm:$0xff]   ;;  %v3007_v47 = vld [vmem:[#allocation2 + $0x3ec] ss:$16 sps:$4 sm:$0xff]  }
  0x94   :  { %1596 = vmatprep.subr.bf16.mxu0 %v2923_v48  ;;  %v2960_v48 = vld [vmem:[#allocation2 + $0x108] ss:$16 sps:$4 sm:$0xff]  }
  0x95   :  { %1445 = vmatpush1.bf16.msra.mxu1 %v2861_v36  ;;  %v2987_v36 = vld [vmem:[#allocation2 + $0x388] ss:$16 sps:$4 sm:$0xff]  }
  0x96   :  { %1446 = vmatprep.subr.bf16.mxu1 %v2869_v37  ;;  %v2995_v37 = vld [vmem:[#allocation2 + $0x3ac] ss:$16 sps:$4 sm:$0xff]  }
  0x97   :  { %1597 = vmatpush1.bf16.msra.mxu0 %v2921_v51  ;;  %v3055_v51 = vld [vmem:[#allocation2 + $0x60c] ss:$16 sps:$4 sm:$0xff]  }
  0x98   :  { %1598 = vmatprep.subr.bf16.mxu0 %v2929_v52  ;;  %v2966_v52 = vld [vmem:[#allocation2 + $0x128] ss:$16 sps:$4 sm:$0xff]  }
  0x99   :  { %1447 = vmatpush1.bf16.msra.mxu1 %v2867_v41  ;;  %v2993_v41 = vld [vmem:[#allocation2 + $0x3a8] ss:$16 sps:$4 sm:$0xff]  }
  0x9a   :  { %1448 = vmatprep.subr.bf16.mxu1 %v2875_v42  ;;  %v3001_v42 = vld [vmem:[#allocation2 + $0x3cc] ss:$16 sps:$4 sm:$0xff]  }
  0x9b   :  { %1599 = vmatpush1.bf16.msra.mxu0 %v2927_v55  ;;  %v3061_v55 = vld [vmem:[#allocation4 + $0x4] ss:$8 sps:$4 sm:$0xff]  }
  0x9c   :  { %1600 = vmatprep.subr.bf16.mxu0 %v2935_v56  ;;  %v2972_v56 = vld [vmem:[#allocation2 + $0x148] ss:$16 sps:$4 sm:$0xff]  }
  0x9d   :  { %1449 = vmatpush1.bf16.msra.mxu1 %v2873_v44  ;;  %v2962_v44 = vld [vmem:[#allocation2 + $0x10c] ss:$16 sps:$4 sm:$0xff]  }
  0x9e   :  { %1450 = vmatprep.subr.bf16.mxu1 %v2881_v45  ;;  %v2999_v45 = vld [vmem:[#allocation2 + $0x3c8] ss:$16 sps:$4 sm:$0xff]  }
  0x9f   :  { %1601 = vmatpush1.bf16.msra.mxu0 %v2933_v59  ;;  %v2986_v59 = vld [vmem:[#allocation2 + $0x18c] ss:$16 sps:$4 sm:$0xff]  }
  0xa0   :  { %1602 = vmatprep.subr.bf16.mxu0 %v2941_v60  ;;  %v3059_v60 = vld [vmem:[#allocation4] ss:$8 sps:$4 sm:$0xff]  }
  0xa1   :  { %1451 = vmatpush1.bf16.msra.mxu1 %v2879_v49  ;;  %v2968_v49 = vld [vmem:[#allocation2 + $0x12c] ss:$16 sps:$4 sm:$0xff]  }
  0xa2   :  { %1452 = vmatprep.subr.bf16.mxu1 %v2887_v50  ;;  %v3005_v50 = vld [vmem:[#allocation2 + $0x3e8] ss:$16 sps:$4 sm:$0xff]  }
  0xa3   :  { %1603 = vmatpush1.bf16.msra.mxu0 %v2939_v1  ;;  %v2992_v1 = vld [vmem:[#allocation2 + $0x1ac] ss:$16 sps:$4 sm:$0xff]  }
  0xa4   :  { %1604 = vmatprep.subr.bf16.mxu0 %v2947_v2  ;;  %v3062_v2 = vld [vmem:[#allocation4 + $0x10] ss:$8 sps:$4 sm:$0xff]  }
  0xa5   :  { %1453 = vmatpush1.bf16.msra.mxu1 %v2885_v53  ;;  %v2974_v53 = vld [vmem:[#allocation2 + $0x14c] ss:$16 sps:$4 sm:$0xff]  }
  0xa6   :  { %1454 = vmatprep.subr.bf16.mxu1 %v2893_v54  ;;  %v3053_v54 = vld [vmem:[#allocation2 + $0x608] ss:$16 sps:$4 sm:$0xff]  }
  0xa7   :  { %1605 = vmatpush1.bf16.msra.mxu0 %v2945_v5  ;;  %v3065_v5 = vld [vmem:[#allocation4 + $0x20] ss:$8 sps:$4 sm:$0xff]  }
  0xa8   :  { %1606 = vmatprep.subr.bf16.mxu0 %v2953_v7  ;;  %v2996_v7 = vld [vmem:[#allocation2 + $0x1c8] ss:$16 sps:$4 sm:$0xff]  }
  0xa9   :  { %1455 = vmatpush1.bf16.msra.mxu1 %v2891_v57  ;;  %v2980_v57 = vld [vmem:[#allocation2 + $0x16c] ss:$16 sps:$4 sm:$0xff]  }
  0xaa   :  { %1456 = vmatprep.subr.bf16.mxu1 %v2899_v58  ;;  %v2978_v58 = vld [vmem:[#allocation2 + $0x168] ss:$16 sps:$4 sm:$0xff]  }
  0xab   :  { %1607 = vmatpush1.bf16.msra.mxu0 %v2951_v11  ;;  %v3002_v11 = vld [vmem:[#allocation2 + $0x1e8] ss:$16 sps:$4 sm:$0xff]  }
  0xac   :  { %1608 = vmatprep.subr.bf16.mxu0 %v2959_v13  ;;  %v3071_v13 = vld [vmem:[#allocation4 + $0x40] ss:$8 sps:$4 sm:$0xff]  }
  0xad   :  { %1457 = vmatpush1.bf16.msra.mxu1 %v2897_v61  ;;  %v3064_v61 = vld [vmem:[#allocation4 + $0x14] ss:$8 sps:$4 sm:$0xff]  }
  0xae   :  { %1458 = vmatprep.subr.bf16.mxu1 %v2905_v62  ;;  %v2984_v62 = vld [vmem:[#allocation2 + $0x188] ss:$16 sps:$4 sm:$0xff]  }
  0xaf   :  { %1609 = vmatpush1.bf16.msra.mxu0 %v2957_v16  ;;  %v3013_v16 = vld [vmem:[#allocation2 + $0x42c] ss:$16 sps:$4 sm:$0xff]  }
  0xb0   :  { %1610 = vmatprep.subr.bf16.mxu0 %v2965_v17  ;;  %v3074_v17 = vld [vmem:[#allocation4 + $0x50] ss:$8 sps:$4 sm:$0xff]  }
  0xb1   :  { %1459 = vmatpush1.bf16.msra.mxu1 %v2903_v3  ;;  %v3067_v3 = vld [vmem:[#allocation4 + $0x24] ss:$8 sps:$4 sm:$0xff]  }
  0xb2   :  { %1460 = vmatprep.subr.bf16.mxu1 %v2908_v4  ;;  %v2990_v4 = vld [vmem:[#allocation2 + $0x1a8] ss:$16 sps:$4 sm:$0xff]  }
  0xb3   :  { %1611 = vmatpush1.bf16.msra.mxu0 %v2963_v21  ;;  %v3077_v21 = vld [vmem:[#allocation4 + $0x60] ss:$8 sps:$4 sm:$0xff]  }
  0xb4   :  { %1612 = vmatprep.subr.bf16.mxu0 %v2971_v23  ;;  %v3014_v23 = vld [vmem:[#allocation2 + $0x448] ss:$16 sps:$4 sm:$0xff]  }
  0xb5   :  { %1461 = vmatpush1.bf16.msra.mxu1 %v2906_v6  ;;  %v3070_v6 = vld [vmem:[#allocation4 + $0x34] ss:$8 sps:$4 sm:$0xff]  }
  0xb6   :  { %1553 = vmatprep.subr.bf16.mxu1 %v2914_v10  ;;  %v3068_v10 = vld [vmem:[#allocation4 + $0x30] ss:$8 sps:$4 sm:$0xff]  }
  0xb7   :  { %1613 = vmatpush1.bf16.msra.mxu0 %v2969_v24  ;;  %v3019_v24 = vld [vmem:[#allocation2 + $0x46c] ss:$16 sps:$4 sm:$0xff]  }
  0xb8   :  { %1463 = vmatmul.mubr.bf16.vlgmr.msra.gmra.mrb[4].mxu1 %v3406_v12  ;;  %1614 = vmatprep.subr.bf16.mxu0 %v2977_v25  ;;  %v3080_v25 = vld [vmem:[#allocation4 + $0x70] ss:$8 sps:$4 sm:$0xff]  }
  0xb9   :  { %1554 = vmatpush1.bf16.msra.mxu1 %v2912_v14  ;;  %1585 = vmatprep.mubr.bf16.mxu1 %v3366_v27  ;;  %v2983_v27 = vld [vmem:[#allocation2 + $0x36c] ss:$16 sps:$4 sm:$0xff]  }
  0xba   :  { %1555 = vmatprep.subr.bf16.mxu1 %v2920_v15  ;;  %v3076_v14 = vld [vmem:[#allocation4 + $0x54] ss:$8 sps:$4 sm:$0xff]   ;;  %v3008_v15 = vld [vmem:[#allocation2 + $0x408] ss:$16 sps:$4 sm:$0xff]  }
  0xbb   :  { %1615 = vmatpush1.bf16.msra.mxu0 %v2975_v29  ;;  %v3088_v29 = vld [vmem:[#allocation4 + $0x94] ss:$8 sps:$4 sm:$0xff]  }
  0xbc   :  { %1616 = vmatprep.subr.bf16.mxu0 %v2983_v27  ;;  %v3020_v27 = vld [vmem:[#allocation2 + $0x488] ss:$16 sps:$4 sm:$0xff]  }
  0xbd   :  { %1556 = vmatpush1.bf16.msra.mxu1 %v2918_v18  ;;  %v3079_v18 = vld [vmem:[#allocation4 + $0x64] ss:$8 sps:$4 sm:$0xff]  }
  0xbe   :  { %1557 = vmatprep.subr.bf16.mxu1 %v2926_v19  ;;  %v3011_v19 = vld [vmem:[#allocation2 + $0x428] ss:$16 sps:$4 sm:$0xff]  }
  0xbf   :  { %1617 = vmatpush1.bf16.msra.mxu0 %v2981_v32  ;;  %v3091_v32 = vld [vmem:[#allocation4 + $0xa4] ss:$8 sps:$4 sm:$0xff]  }
  0xc0   :  { %1618 = vmatprep.subr.bf16.mxu0 %v2989_v33  ;;  %v3023_v33 = vld [vmem:[#allocation2 + $0x4a8] ss:$16 sps:$4 sm:$0xff]  }
  0xc1   :  { %1558 = vmatpush1.bf16.msra.mxu1 %v2924_v20  ;;  %v3016_v20 = vld [vmem:[#allocation2 + $0x44c] ss:$16 sps:$4 sm:$0xff]  }
  0xc2   :  { %1559 = vmatprep.subr.bf16.mxu1 %v2932_v22  ;;  %v3082_v22 = vld [vmem:[#allocation4 + $0x74] ss:$8 sps:$4 sm:$0xff]  }
  0xc3   :  { %1619 = vmatpush1.bf16.msra.mxu0 %v2987_v36  ;;  %v3094_v36 = vld [vmem:[#allocation4 + $0xb4] ss:$8 sps:$4 sm:$0xff]  }
  0xc4   :  { %1620 = vmatprep.subr.bf16.mxu0 %v2995_v37  ;;  %v3026_v37 = vld [vmem:[#allocation2 + $0x4c8] ss:$16 sps:$4 sm:$0xff]  }
  0xc5   :  { %1560 = vmatpush1.bf16.msra.mxu1 %v2930_v26  ;;  %v3017_v26 = vld [vmem:[#allocation2 + $0x468] ss:$16 sps:$4 sm:$0xff]  }
  0xc6   :  { %1561 = vmatprep.subr.bf16.mxu1 %v2938_v28  ;;  %v3022_v28 = vld [vmem:[#allocation2 + $0x48c] ss:$16 sps:$4 sm:$0xff]  }
  0xc7   :  { %1621 = vmatpush1.bf16.msra.mxu0 %v2993_v41  ;;  %v3097_v41 = vld [vmem:[#allocation4 + $0xc4] ss:$8 sps:$4 sm:$0xff]  }
  0xc8   :  { %1622 = vmatprep.subr.bf16.mxu0 %v3001_v42  ;;  %v3029_v42 = vld [vmem:[#allocation2 + $0x4e8] ss:$16 sps:$4 sm:$0xff]  }
  0xc9   :  { %1562 = vmatpush1.bf16.msra.mxu1 %v2936_v30  ;;  %v3025_v30 = vld [vmem:[#allocation2 + $0x4ac] ss:$16 sps:$4 sm:$0xff]  }
  0xca   :  { %1563 = vmatprep.subr.bf16.mxu1 %v2944_v31  ;;  %v3086_v31 = vld [vmem:[#allocation4 + $0x90] ss:$8 sps:$4 sm:$0xff]  }
  0xcb   :  { %1623 = vmatpush1.bf16.msra.mxu0 %v2999_v45  ;;  %v3100_v45 = vld [vmem:[#allocation4 + $0xd4] ss:$8 sps:$4 sm:$0xff]  }
  0xcc   :  { %1624 = vmatprep.subr.bf16.mxu0 %v3007_v47  ;;  %v3032_v47 = vld [vmem:[#allocation2 + $0x508] ss:$16 sps:$4 sm:$0xff]  }
  0xcd   :  { %1564 = vmatpush1.bf16.msra.mxu1 %v2942_v34  ;;  %v3028_v34 = vld [vmem:[#allocation2 + $0x4cc] ss:$16 sps:$4 sm:$0xff]  }
  0xce   :  { %1565 = vmatprep.subr.bf16.mxu1 %v2950_v35  ;;  %v3089_v35 = vld [vmem:[#allocation4 + $0xa0] ss:$8 sps:$4 sm:$0xff]  }
  0xcf   :  { %1625 = vmatpush1.bf16.msra.mxu0 %v3005_v50  ;;  %v3103_v50 = vld [vmem:[#allocation4 + $0xe4] ss:$8 sps:$4 sm:$0xff]  }
  0xd0   :  { %1676 = vmatprep.subr.bf16.mxu0 %v3055_v51  ;;  %v3035_v51 = vld [vmem:[#allocation2 + $0x528] ss:$16 sps:$4 sm:$0xff]  }
  0xd1   :  { %1566 = vmatpush1.bf16.msra.mxu1 %v2948_v39  ;;  %v3031_v39 = vld [vmem:[#allocation2 + $0x4ec] ss:$16 sps:$4 sm:$0xff]  }
  0xd2   :  { %1567 = vmatprep.subr.bf16.mxu1 %v2956_v40  ;;  %1627 = vmatmul.mubr.bf16.vlgmr.msra.gmra.mrb[16].mxu0 %v3406_v12  ;;  %v3010_v12 = vld [vmem:[#allocation2 + $0x40c] ss:$16 sps:$4 sm:$0xff]   ;;  %v3092_v40 = vld [vmem:[#allocation4 + $0xb0] ss:$8 sps:$4 sm:$0xff]  }
  0xd3   :  { %1677 = vmatpush1.bf16.msra.mxu0 %v3053_v54  ;;  %1708 = vmatprep.mubr.bf16.mxu0 %v3254_v0  ;;  %v2998_v0 = vld [vmem:[#allocation2 + $0x1cc] ss:$16 sps:$4 sm:$0xff]  }
  0xd4   :  { %2155 = vmatprep.subr.bf16.mxu0 %v3061_v55  ;;  %v3106_v54 = vld [vmem:[#allocation4 + $0xf4] ss:$8 sps:$4 sm:$0xff]   ;;  %v3038_v55 = vld [vmem:[#allocation2 + $0x548] ss:$16 sps:$4 sm:$0xff]  }
  0xd5   :  { %1568 = vmatpush1.bf16.msra.mxu1 %v2954_v43  ;;  %v3034_v43 = vld [vmem:[#allocation2 + $0x50c] ss:$16 sps:$4 sm:$0xff]  }
  0xd6   :  { %1569 = vmatprep.subr.bf16.mxu1 %v2962_v44  ;;  %v3095_v44 = vld [vmem:[#allocation4 + $0xc0] ss:$8 sps:$4 sm:$0xff]  }
  0xd9   :  { %1570 = vmatpush1.bf16.msra.mxu1 %v2960_v48  ;;  %v3037_v48 = vld [vmem:[#allocation2 + $0x52c] ss:$16 sps:$4 sm:$0xff]  }
  0xda   :  { %1571 = vmatprep.subr.bf16.mxu1 %v2968_v49  ;;  %2638 = vmatmul.mubr.msk.bf16.vlgmr.msra.gmra.mrb[20].mxu0 %vm1385_vm2, %v3398_v46  ;;  %v3073_v46 = vld [vmem:[#allocation4 + $0x44] ss:$8 sps:$4 sm:$0xff]   ;;  %v3098_v49 = vld [vmem:[#allocation4 + $0xd0] ss:$8 sps:$4 sm:$0xff]  }
  0xdb   :  { %2156 = vmatpush1.bf16.msra.mxu0 %v3059_v60  ;;  %v3046_v60 = vld [vmem:[#allocation2 + $0x58c] ss:$16 sps:$4 sm:$0xff]  }
  0xdc   :  { %2157 = vmatprep.subr.bf16.mxu0 %v3064_v61 }
  0xdd   :  { %1572 = vmatpush1.bf16.msra.mxu1 %v2966_v52  ;;  %v3040_v52 = vld [vmem:[#allocation2 + $0x54c] ss:$16 sps:$4 sm:$0xff]  }
  0xde   :  { %1573 = vmatprep.subr.bf16.mxu1 %v2974_v53  ;;  %v3101_v53 = vld [vmem:[#allocation4 + $0xe0] ss:$8 sps:$4 sm:$0xff]  }
  0xdf   :  { %2158 = vmatpush1.bf16.msra.mxu0 %v3062_v2  ;;  %v3044_v2 = vld [vmem:[#allocation2 + $0x588] ss:$16 sps:$4 sm:$0xff]  }
  0xe0   :  { %2159 = vmatprep.subr.bf16.mxu0 %v3067_v3  ;;  %v3049_v3 = vld [vmem:[#allocation2 + $0x5ac] ss:$16 sps:$4 sm:$0xff]  }
  0xe1   :  { %1574 = vmatpush1.bf16.msra.mxu1 %v2972_v56  ;;  %v3043_v56 = vld [vmem:[#allocation2 + $0x56c] ss:$16 sps:$4 sm:$0xff]  }
  0xe2   :  { %1575 = vmatprep.subr.bf16.mxu1 %v2980_v57  ;;  %v3104_v57 = vld [vmem:[#allocation4 + $0xf0] ss:$8 sps:$4 sm:$0xff]  }
  0xe3   :  { %2160 = vmatpush1.bf16.msra.mxu0 %v3065_v5  ;;  %v3052_v5 = vld [vmem:[#allocation2 + $0x5cc] ss:$16 sps:$4 sm:$0xff]  }
  0xe4   :  { %2161 = vmatprep.subr.bf16.mxu0 %v3070_v6 }
  0xe5   :  { %1576 = vmatpush1.bf16.msra.mxu1 %v2978_v58  ;;  %v3041_v58 = vld [vmem:[#allocation2 + $0x568] ss:$16 sps:$4 sm:$0xff]  }
  0xe6   :  { %1577 = vmatprep.subr.bf16.mxu1 %v2986_v59 }
  0xe7   :  { %2162 = vmatpush1.bf16.msra.mxu0 %v3068_v10  ;;  %v3050_v10 = vld [vmem:[#allocation2 + $0x5c8] ss:$16 sps:$4 sm:$0xff]  }
  0xe8   :  { %2163 = vmatprep.subr.bf16.mxu0 %v3073_v46  ;;  %v3058_v46 = vld [vmem:[#allocation2 + $0x5ec] ss:$16 sps:$4 sm:$0xff]  }
  0xe9   :  { %1578 = vmatpush1.bf16.msra.mxu1 %v2984_v62 }
  0xea   :  { %1579 = vmatprep.subr.bf16.mxu1 %v2992_v1 }
  0xeb   :  { %2164 = vmatpush1.bf16.msra.mxu0 %v3071_v13 }
  0xec   :  { %2165 = vmatprep.subr.bf16.mxu0 %v3076_v14 }
  0xed   :  { %1580 = vmatpush1.bf16.msra.mxu1 %v2990_v4  ;;  %v3047_v4 = vld [vmem:[#allocation2 + $0x5a8] ss:$16 sps:$4 sm:$0xff]  }
  0xee   :  { %1581 = vmatprep.subr.bf16.mxu1 %v2998_v0 }
  0xef   :  { %2166 = vmatpush1.bf16.msra.mxu0 %v3074_v17 }
  0xf0   :  { %2167 = vmatprep.subr.bf16.mxu0 %v3079_v18  ;;  %v3109_v18 = vld [vmem:[#allocation4 + $0x104] ss:$8 sps:$4 sm:$0xff]  }
  0xf1   :  { %1582 = vmatpush1.bf16.msra.mxu1 %v2996_v7 }
  0xf2   :  { %1583 = vmatprep.subr.bf16.mxu1 %v3004_v9 }
  0xf3   :  { %2168 = vmatpush1.bf16.msra.mxu0 %v3077_v21 }
  0xf4   :  { %2169 = vmatprep.subr.bf16.mxu0 %v3082_v22 }
  0xf5   :  { %1584 = vmatpush1.bf16.msra.mxu1 %v3002_v11  ;;  %v3056_v11 = vld [vmem:[#allocation2 + $0x5e8] ss:$16 sps:$4 sm:$0xff]  }
  0xf6   :  { %1635 = vmatprep.subr.bf16.mxu1 %v3010_v12 }
  0xf7   :  { %2170 = vmatpush1.bf16.msra.mxu0 %v3080_v25 }
  0xf8   :  { %1586 = vmatmul.mubr.bf16.vlgmr.msra.gmra.mrb[8].mxu1 %v3373_v63  ;;  %v3085_v63 = vld [vmem:[#allocation4 + $0x84] ss:$8 sps:$4 sm:$0xff]  }
  0xf9   :  { %1636 = vmatpush1.bf16.msra.mxu1 %v3008_v15  ;;  %1667 = vmatprep.mubr.bf16.mxu1 %v3379_v8  ;;  %v3083_v8 = vld [vmem:[#allocation4 + $0x80] ss:$8 sps:$4 sm:$0xff]  }
  0xfa   :  { %1637 = vmatprep.subr.bf16.mxu1 %v3013_v16  ;;  %2171 = vmatprep.subr.bf16.mxu0 %v3085_v63 }
  0xfb   :  { %2172 = vmatpush1.bf16.msra.mxu0 %v3083_v8 }
  0xfc   :  { %2173 = vmatprep.subr.bf16.mxu0 %v3088_v29  ;;  %v3427_v29 = vld [vmem:[%s3459_s4] sm:$0xf] }
  0xfd   :  { %1638 = vmatpush1.bf16.msra.mxu1 %v3011_v19 }
  0xfe   :  { %1639 = vmatprep.subr.bf16.mxu1 %v3016_v20 }
  0xff   :  { %2174 = vmatpush1.bf16.msra.mxu0 %v3086_v31 }
 0x100   :  { %2175 = vmatprep.subr.bf16.mxu0 %v3091_v32 }
 0x101   :  { %1640 = vmatpush1.bf16.msra.mxu1 %v3014_v23 }
 0x102   :  { %1641 = vmatprep.subr.bf16.mxu1 %v3019_v24 }
 0x103   :  { %2176 = vmatpush1.bf16.msra.mxu0 %v3089_v35 }
 0x104   :  { %2177 = vmatprep.subr.bf16.mxu0 %v3094_v36 }
 0x105   :  { %1642 = vmatpush1.bf16.msra.mxu1 %v3017_v26  ;;  %v1719_v26 = vlaneseq }
 0x106   :  { %1643 = vmatprep.subr.bf16.mxu1 %v3022_v28 }
 0x107   :  { %2178 = vmatpush1.bf16.msra.mxu0 %v3092_v40  ;;  %v3421_v28 = vshrl.u32 %v1719_v26, 7  ;;  %v3134_v26 = vld [vmem:[#allocation4 + $0x190] ss:$8 sps:$4 sm:$0xff]  }
 0x108   :  { %2179 = vmatprep.subr.bf16.mxu0 %v3097_v41 }
 0x109   :  { %1644 = vmatpush1.bf16.msra.mxu1 %v3020_v27  ;;  %v1725_v27 = vsub.s32 1, %v3421_v28 }
 0x10a   :  { %1645 = vmatprep.subr.bf16.mxu1 %v3025_v30 }
 0x10b   :  { %2180 = vmatpush1.bf16.msra.mxu0 %v3095_v44 }
 0x10c   :  { %2181 = vmatprep.subr.bf16.mxu0 %v3100_v45 }
 0x10d   :  { %1646 = vmatpush1.bf16.msra.mxu1 %v3023_v33 }
 0x10e   :  { %1647 = vmatprep.subr.bf16.mxu1 %v3028_v34 }
 0x10f   :  { %2182 = vmatpush1.bf16.msra.mxu0 %v3098_v49 }
 0x110   :  { %2183 = vmatprep.subr.bf16.mxu0 %v3103_v50  ;;  %v3107_v50 = vld [vmem:[#allocation4 + $0x100] ss:$8 sps:$4 sm:$0xff]  }
 0x111   :  { %1648 = vmatpush1.bf16.msra.mxu1 %v3026_v37 }
 0x112   :  { %1649 = vmatprep.subr.bf16.mxu1 %v3031_v39  ;;  %v1726_v39 = vrot.slane %v3427_v29, %v1725_v27 }
 0x113   :  { %2184 = vmatpush1.bf16.msra.mxu0 %v3101_v53  ;;  %v3155_v53 = vld [vmem:[#allocation6 + $0x40] sm:$0xff]  }
 0x114   :  { %2185 = vmatprep.subr.bf16.mxu0 %v3106_v54  ;;  %v3156_v54 = vld [vmem:[#allocation6] sm:$0xff]  }
 0x115   :  { %1650 = vmatpush1.bf16.msra.mxu1 %v3029_v42  ;;  %v357_v59 = vpop.f32.mrb[0].mxu0 }
 0x116   :  { %1651 = vmatprep.subr.bf16.mxu1 %v3034_v43  ;;  %v359_v61 = vpop.f32.mrb[1].mxu0 }
 0x117   :  { %v361_v62 = vpop.f32.mrb[2].mxu0  ;;  %2186 = vmatpush1.bf16.msra.mxu0 %v3104_v57  ;;  %v3158_v57 = vld [vmem:[#allocation6 + $0x8] sm:$0xff]  }
 0x118   :  { %v362_v1 = vpop.f32.mrb[3].mxu0  ;;  %2196 = vmatprep.subr.bf16.mxu0 %v3109_v18  ;;  %v3118_v62 = vld [vmem:[#allocation4 + $0x134] ss:$8 sps:$4 sm:$0xff]  }
 0x119   :  { %1652 = vmatpush1.bf16.msra.mxu1 %v3032_v47  ;;  %v3161_v1 = vld [vmem:[#allocation6 + $0x58] sm:$0xff]  }
 0x11a   :  { %1653 = vmatprep.subr.bf16.mxu1 %v3037_v48 }
 0x11d   :  { %1654 = vmatpush1.bf16.msra.mxu1 %v3035_v51  ;;  %v3416_v0 = vpop.f32.mrb[4].mxu0  ;;  %v3112_v51 = vld [vmem:[#allocation4 + $0x114] ss:$8 sps:$4 sm:$0xff]  }
 0x11e   :  { %1655 = vmatprep.subr.bf16.mxu1 %v3040_v52  ;;  %v3418_v6 = vpop.f32.mrb[5].mxu0 }
 0x11f   :  { %v402_v7 = vpop.f32.mrb[6].mxu0 }
 0x120   :  { %v403_v9 = vpop.f32.mrb[7].mxu0  ;;  %v3119_v7 = vld [vmem:[#allocation4 + $0x140] ss:$8 sps:$4 sm:$0xff]  }
 0x121   :  { %1656 = vmatpush1.bf16.msra.mxu1 %v3038_v55  ;;  %v3157_v55 = vld [vmem:[#allocation6 + $0x48] sm:$0xff]   ;;  %v3164_v9 = vld [vmem:[#allocation6 + $0x20] sm:$0xff]  }
 0x122   :  { %1657 = vmatprep.subr.bf16.mxu1 %v3043_v56  ;;  %v3110_v56 = vld [vmem:[#allocation4 + $0x110] ss:$8 sps:$4 sm:$0xff]  }
 0x125   :  { %1658 = vmatpush1.bf16.msra.mxu1 %v3041_v58  ;;  %v3115_v58 = vld [vmem:[#allocation4 + $0x124] ss:$8 sps:$4 sm:$0xff]  }
 0x126   :  { %1659 = vmatprep.subr.bf16.mxu1 %v3046_v60  ;;  %v3113_v60 = vld [vmem:[#allocation4 + $0x120] ss:$8 sps:$4 sm:$0xff]  }
 0x129   :  { %1660 = vmatpush1.bf16.msra.mxu1 %v3044_v2  ;;  %v3116_v2 = vld [vmem:[#allocation4 + $0x130] ss:$8 sps:$4 sm:$0xff]  }
 0x12a   :  { %1661 = vmatprep.subr.bf16.mxu1 %v3049_v3  ;;  %v3162_v3 = vld [vmem:[#allocation6 + $0x18] sm:$0xff]  }
 0x12d   :  { %1662 = vmatpush1.bf16.msra.mxu1 %v3047_v4  ;;  %v3121_v4 = vld [vmem:[#allocation4 + $0x144] ss:$8 sps:$4 sm:$0xff]  }
 0x12e   :  { %1663 = vmatprep.subr.bf16.mxu1 %v3052_v5  ;;  %v3163_v5 = vld [vmem:[#allocation6 + $0x60] sm:$0xff]  }
 0x131   :  { %1664 = vmatpush1.bf16.msra.mxu1 %v3050_v10  ;;  %v3124_v10 = vld [vmem:[#allocation4 + $0x154] ss:$8 sps:$4 sm:$0xff]  }
 0x132   :  { %1665 = vmatprep.subr.bf16.mxu1 %v3058_v46  ;;  %v3165_v46 = vld [vmem:[#allocation6 + $0x68] sm:$0xff]  }
 0x135   :  { %1666 = vmatpush1.bf16.msra.mxu1 %v3056_v11  ;;  %v3122_v11 = vld [vmem:[#allocation4 + $0x150] ss:$8 sps:$4 sm:$0xff]  }
 0x136   :  { %2721 = vmatprep.subr.bf16.mxu1 %v3155_v53 }
 0x138   :  { %1668 = vmatmul.mubr.bf16.vlgmr.msra.gmra.mrb[12].mxu1 %v3391_v38  ;;  %v1721_v38 = vsub.s32 0, %v3421_v28 }
 0x139   :  { %2722 = vmatpush3.bf16.msra.mxu1 %v3156_v54 }
 0x13a   :  { %v1722_v36 = vrot.slane %v3427_v29, %v1721_v38  ;;  %2723 = vmatprep.subr.bf16.mxu1 %v3157_v55 }
 0x13d   :  { %2724 = vmatpush3.bf16.msra.mxu1 %v3158_v57 }
 0x14b   :  { %v1423_v12 = vpop.f32.mrb[0].mxu1 }
 0x14c   :  { %v1424_v13 = vadd.f32 %v1423_v12, %v357_v59  ;;  %v1425_v14 = vpop.f32.mrb[1].mxu1  ;;  %v3159_v59 = vld [vmem:[#allocation6 + $0x50] sm:$0xff]   ;;  %v3166_v12 = vld [vmem:[#allocation6 + $0x28] sm:$0xff]  }
 0x14d   :  { %v1426_v15 = vadd.f32 %v1425_v14, %v359_v61  ;;  %v1427_v16 = vpop.f32.mrb[2].mxu1  ;;  %v3160_v61 = vld [vmem:[#allocation6 + $0x10] sm:$0xff]   ;;  %2725 = vmatprep.subr.bf16.mxu1 %v3159_v59  ;;  %v3125_v14 = vld [vmem:[#allocation4 + $0x160] ss:$8 sps:$4 sm:$0xff]  }
 0x14e   :  { %v1428_v17 = vpop.f32.mrb[3].mxu1  ;;  %2726 = vmatpush3.bf16.msra.mxu1 %v3160_v61  ;;  %v3130_v16 = vld [vmem:[#allocation4 + $0x174] ss:$8 sps:$4 sm:$0xff]  }
 0x14f   :  { %2727 = vmatprep.subr.bf16.mxu1 %v3161_v1 }
 0x152   :  { %2728 = vmatpush3.bf16.msra.mxu1 %v3162_v3 }
 0x153   :  { %2729 = vmatprep.subr.bf16.mxu1 %v3163_v5 }
 0x156   :  { %2730 = vmatpush3.bf16.msra.mxu1 %v3164_v9 }
 0x157   :  { %2731 = vmatprep.subr.bf16.mxu1 %v3165_v46  ;;  %v3168_v46 = vld [vmem:[#allocation6 + $0x30] sm:$0xff]  }
 0x15a   :  { %2732 = vmatpush3.bf16.msra.mxu1 %v3166_v12  ;;  %v1823_v12 = vld [vmem:[%s3461_s6] sm:$0x3] }
 0x15d   :  { %v1505_v19 = vpop.f32.mrb[8].mxu0 }
 0x15e   :  { %v1507_v20 = vpop.f32.mrb[9].mxu0 }
 0x15f   :  { %v1509_v21 = vpop.f32.mrb[10].mxu0 }
 0x160   :  { %v1510_v22 = vpop.f32.mrb[11].mxu0  ;;  %v3133_v21 = vld [vmem:[#allocation4 + $0x184] ss:$8 sps:$4 sm:$0xff]  }
 0x161   :  { %v3131_v22 = vld [vmem:[#allocation4 + $0x180] ss:$8 sps:$4 sm:$0xff]  }
 0x165   :  { %v1546_v23 = vpop.f32.mrb[12].mxu0 }
 0x166   :  { %v1548_v24 = vpop.f32.mrb[13].mxu0 }
 0x167   :  { %v1550_v25 = vpop.f32.mrb[14].mxu0 }
 0x168   :  { %v1551_v63 = vpop.f32.mrb[15].mxu0 }
 0x18b   :  { %v1464_v8 = vpop.f32.mrb[4].mxu1 }
 0x18c   :  { %v1465_v30 = vadd.f32 %v1464_v8, %v1424_v13  ;;  %v1466_v31 = vpop.f32.mrb[5].mxu1  ;;  %v3127_v13 = vld [vmem:[#allocation4 + $0x164] ss:$8 sps:$4 sm:$0xff]  }
 0x18d   :  { %v1467_v32 = vadd.f32 %v1466_v31, %v1426_v15  ;;  %v1468_v33 = vpop.f32.mrb[6].mxu1  ;;  %v3137_v31 = vld [vmem:[#allocation4 + $0x1a0] ss:$8 sps:$4 sm:$0xff]  }
 0x18e   :  { %v1506_v34 = vadd.f32 %v1505_v19, %v1465_v30  ;;  %v1469_v35 = vpop.f32.mrb[7].mxu1  ;;  %v3128_v19 = vld [vmem:[#allocation4 + $0x170] ss:$8 sps:$4 sm:$0xff]   ;;  %v3139_v30 = vld [vmem:[#allocation4 + $0x1a4] ss:$8 sps:$4 sm:$0xff]  }
 0x18f   :  { %v1508_v37 = vadd.f32 %v1507_v20, %v1467_v32  ;;  %v3142_v32 = vld [vmem:[#allocation4 + $0x1b4] ss:$8 sps:$4 sm:$0xff]   ;;  %v3140_v33 = vld [vmem:[#allocation4 + $0x1b0] ss:$8 sps:$4 sm:$0xff]   ;;  %v3143_v35 = vld [vmem:[#allocation4 + $0x1c0] ss:$8 sps:$4 sm:$0xff]  }
 0x190   :  { %v1547_v40 = vadd.f32 %v1546_v23, %v1506_v34  ;;  %v3136_v23 = vld [vmem:[#allocation4 + $0x194] ss:$8 sps:$4 sm:$0xff]   ;;  %v3145_v34 = vld [vmem:[#allocation4 + $0x1c4] ss:$8 sps:$4 sm:$0xff]  }
 0x191   :  { %v1549_v41 = vadd.f32 %v1548_v24, %v1508_v37 }
 0x192   :  { %v1739_v42 = vadd.f32 %v1722_v36, %v1547_v40  ;;  %v3148_v36 = vld [vmem:[#allocation4 + $0x1d4] ss:$8 sps:$4 sm:$0xff]  }
 0x193   :  { %v1740_v43 = vadd.f32 %v1726_v39, %v1549_v41  ;;  %v3146_v41 = vld [vmem:[#allocation4 + $0x1d0] ss:$8 sps:$4 sm:$0xff]  }
 0x194   :  { %vm1743_vm3 = vcmp.gt.f32.partialorder %v1739_v42, 0.0  ;;  %v1747_v44 = vmul.f32 0.2, %v1739_v42 }
 0x195   :  { %v1748_v45 = vmul.f32 0.2, %v1740_v43  ;;  %vm1744_vm4 = vcmp.gt.f32.partialorder %v1740_v43, 0.0 }
 0x196   :  { %v1751_v47 = vsel %vm1743_vm3, %v1739_v42, %v1747_v44  ;;  %v3151_v44 = vld [vmem:[#allocation4 + $0x1e4] ss:$8 sps:$4 sm:$0xff]  }
 0x197   :  { %v1752_v48 = vsel %vm1744_vm4, %v1740_v43, %v1748_v45  ;;  %v1755_v52 = vpack.c.bf16 %v1751_v47, %v1751_v47 }
 0x198   :  { %v1756_v49 = vpack.c.bf16 %v1752_v48, %v1752_v48 }
 0x19a   :  { %2187 = vmatprep.mubr.bf16.mxu0 %v1756_v49  ;;  %v3149_v49 = vld [vmem:[#allocation4 + $0x1e0] ss:$8 sps:$4 sm:$0xff]  }
 0x19b   :  { %2188 = vmatmul.mubr.bf16.vlgmr.msra.gmra.mrb[24].mxu0 %v1755_v52  ;;  %v1733_v52 = vsub.s32 3, %v3421_v28 }
 0x19c   :  { %2197 = vmatpush1.bf16.msra.mxu0 %v3107_v50  ;;  %v3154_v50 = vld [vmem:[#allocation4 + $0x1f4] ss:$8 sps:$4 sm:$0xff]  }
 0x19d   :  { %2198 = vmatprep.subr.bf16.mxu0 %v3112_v51  ;;  %v3152_v51 = vld [vmem:[#allocation4 + $0x1f0] ss:$8 sps:$4 sm:$0xff]   ;;  %v1734_v57 = vrot.slane %v3427_v29, %v1733_v52 }
 0x1a0   :  { %2199 = vmatpush1.bf16.msra.mxu0 %v3110_v56 }
 0x1a1   :  { %2200 = vmatprep.subr.bf16.mxu0 %v3115_v58 }
 0x1a4   :  { %2201 = vmatpush1.bf16.msra.mxu0 %v3113_v60 }
 0x1a5   :  { %2202 = vmatprep.subr.bf16.mxu0 %v3118_v62  ;;  %v1628_v15 = vpop.f32.mrb[16].mxu0 }
 0x1a6   :  { %v1630_v17 = vpop.f32.mrb[17].mxu0 }
 0x1a7   :  { %v1632_v18 = vpop.f32.mrb[18].mxu0 }
 0x1a8   :  { %2203 = vmatpush1.bf16.msra.mxu0 %v3116_v2  ;;  %v1633_v20 = vpop.f32.mrb[19].mxu0 }
 0x1a9   :  { %2204 = vmatprep.subr.bf16.mxu0 %v3121_v4 }
 0x1ac   :  { %2205 = vmatpush1.bf16.msra.mxu0 %v3119_v7 }
 0x1ad   :  { %2206 = vmatprep.subr.bf16.mxu0 %v3124_v10  ;;  %v1710_v24 = vpop.f32.mrb[20].mxu0  ;;  %v3167_v10 = vld [vmem:[#allocation6 + $0x70] sm:$0xff]  }
 0x1ae   :  { %v1712_v25 = vpop.f32.mrb[21].mxu0  ;;  %2733 = vmatprep.subr.bf16.mxu1 %v3167_v10 }
 0x1af   :  { %v1714_v63 = vpop.f32.mrb[22].mxu0  ;;  %2734 = vmatpush3.bf16.msra.mxu1 %v3168_v46 }
 0x1b0   :  { %2207 = vmatpush1.bf16.msra.mxu0 %v3122_v11  ;;  %v1715_v8 = vpop.f32.mrb[23].mxu0  ;;  %v3170_v11 = vld [vmem:[#allocation6 + $0x38] sm:$0xff]  }
 0x1b1   :  { %2208 = vmatprep.subr.bf16.mxu0 %v3127_v13  ;;  %v1828_v13 = vrot.slane %v1823_v12, %v1721_v38 }
 0x1b4   :  { %2209 = vmatpush1.bf16.msra.mxu0 %v3125_v14  ;;  %v1832_v14 = vrot.slane %v1823_v12, %v1725_v27 }
 0x1b5   :  { %2210 = vmatprep.subr.bf16.mxu0 %v3130_v16 }
 0x1b8   :  { %2211 = vmatpush1.bf16.msra.mxu0 %v3128_v19 }
 0x1b9   :  { %2212 = vmatprep.subr.bf16.mxu0 %v3133_v21 }
 0x1bc   :  { %2213 = vmatpush1.bf16.msra.mxu0 %v3131_v22 }
 0x1bd   :  { %2214 = vmatprep.subr.bf16.mxu0 %v3136_v23 }
 0x1c0   :  { %2215 = vmatpush1.bf16.msra.mxu0 %v3134_v26 }
 0x1c1   :  { %2216 = vmatprep.subr.bf16.mxu0 %v3139_v30 }
 0x1c4   :  { %2217 = vmatpush1.bf16.msra.mxu0 %v3137_v31 }
 0x1c5   :  { %2218 = vmatprep.subr.bf16.mxu0 %v3142_v32 }
 0x1c8   :  { %2219 = vmatpush1.bf16.msra.mxu0 %v3140_v33 }
 0x1c9   :  { %2220 = vmatprep.subr.bf16.mxu0 %v3145_v34 }
 0x1cb   :  { %v1587_v37 = vpop.f32.mrb[8].mxu1 }
 0x1cc   :  { %v1588_v39 = vadd.f32 %v1587_v37, %v3416_v0  ;;  %v1589_v40 = vpop.f32.mrb[9].mxu1  ;;  %2221 = vmatpush1.bf16.msra.mxu0 %v3143_v35  ;;  %v1729_v0 = vsub.s32 2, %v3421_v28  ;;  %v2703_v28 = vld [vmem:[%s3463_s8] ss:$0 sm:$0xff] }
 0x1cd   :  { %v1590_v42 = vadd.f32 %v1589_v40, %v3418_v6  ;;  %v1591_v43 = vpop.f32.mrb[10].mxu1  ;;  %2222 = vmatprep.subr.bf16.mxu0 %v3148_v36 }
 0x1ce   :  { %v1629_v45 = vadd.f32 %v1628_v15, %v1588_v39  ;;  %v1592_v47 = vpop.f32.mrb[11].mxu1  ;;  %v1730_v54 = vrot.slane %v3427_v29, %v1729_v0  ;;  %v3169_v29 = vld [vmem:[#allocation6 + $0x78] sm:$0xff]  }
 0x1cf   :  { %v1631_v48 = vadd.f32 %v1630_v17, %v1590_v42  ;;  %2735 = vmatprep.subr.bf16.mxu1 %v3169_v29 }
 0x1d0   :  { %2223 = vmatpush1.bf16.msra.mxu0 %v3146_v41  ;;  %2736 = vmatpush3.bf16.msra.mxu1 %v3170_v11 }
 0x1d1   :  { %2224 = vmatprep.subr.bf16.mxu0 %v3151_v44 }
 0x1d4   :  { %2225 = vmatpush1.bf16.msra.mxu0 %v3149_v49 }
 0x1d5   :  { %2226 = vmatprep.subr.bf16.mxu0 %v3154_v50 }
 0x1d8   :  { %2227 = vmatpush1.bf16.msra.mxu0 %v3152_v51 }
 0x20b   :  { %v1669_v53 = vpop.f32.mrb[12].mxu1 }
 0x20c   :  { %v1670_v6 = vadd.f32 %v1669_v53, %v1629_v45  ;;  %v1671_v55 = vpop.f32.mrb[13].mxu1 }
 0x20d   :  { %v1672_v56 = vadd.f32 %v1671_v55, %v1631_v48  ;;  %v1673_v58 = vpop.f32.mrb[14].mxu1 }
 0x20e   :  { %v1711_v59 = vadd.f32 %v1710_v24, %v1670_v6  ;;  %v1674_v60 = vpop.f32.mrb[15].mxu1 }
 0x20f   :  { %v1713_v61 = vadd.f32 %v1712_v25, %v1672_v56 }
 0x210   :  { %v1741_v62 = vadd.f32 %v1730_v54, %v1711_v59 }
 0x211   :  { %v1742_v1 = vadd.f32 %v1734_v57, %v1713_v61 }
 0x212   :  { %vm1745_vm5 = vcmp.gt.f32.partialorder %v1741_v62, 0.0  ;;  %v1749_v2 = vmul.f32 0.2, %v1741_v62 }
 0x213   :  { %vm1746_vm6 = vcmp.gt.f32.partialorder %v1742_v1, 0.0  ;;  %v1750_v3 = vmul.f32 0.2, %v1742_v1 }
 0x214   :  { %v1753_v4 = vsel %vm1745_vm5, %v1741_v62, %v1749_v2 }
 0x215   :  { %v1754_v5 = vsel %vm1746_vm6, %v1742_v1, %v1750_v3  ;;  %v1757_v9 = vpack.c.bf16 %v1753_v4, %v1753_v4 }
 0x216   :  { %v1758_v7 = vpack.c.bf16 %v1754_v5, %v1754_v5 }
 0x218   :  { %2228 = vmatprep.mubr.bf16.mxu0 %v1758_v7 }
 0x219   :  { %2229 = vmatmul.mubr.bf16.vlgmr.msra.gmra.mrb[24].mxu0 %v1757_v9 }
 0x2ec   :  { %v2230_v15 = vpop.f32.mrb[24].mxu0 }
 0x2ed   :  { %v2743_v16 = vadd.f32 %v2230_v15, %v1828_v13  ;;  %v2232_v17 = vpop.f32.mrb[25].mxu0 }
 0x2ee   :  { %v2744_v18 = vadd.f32 %v2232_v17, %v1832_v14  ;;  %v2234_v19 = vpop.f32.mrb[26].mxu0 }
 0x2ef   :  { %vm2237_vm7 = vcmp.gt.f32.partialorder %v2743_v16, 0.0  ;;  %v2239_v20 = vmul.f32 0.2, %v2743_v16  ;;  %v2235_v21 = vpop.f32.mrb[27].mxu0 }
 0x2f0   :  { %vm2238_vm8 = vcmp.gt.f32.partialorder %v2744_v18, 0.0  ;;  %v2240_v22 = vmul.f32 0.2, %v2744_v18 }
 0x2f1   :  { %v2241_v23 = vsel %vm2237_vm7, %v2743_v16, %v2239_v20 }
 0x2f2   :  { %v2242_v24 = vsel %vm2238_vm8, %v2744_v18, %v2240_v22  ;;  %v2243_v63 = vpack.c.bf16 %v2241_v23, %v2241_v23 }
 0x2f3   :  { %v2244_v25 = vpack.c.bf16 %v2242_v24, %v2242_v24 }
 0x2f5   :  { %2412 = vmatprep.mubr.bf16.mxu1 %v2244_v25 }
 0x2f6   :  { %2413 = vmatmul.mubr.bf16.vlgmr.msra.gmra.mrb[16].mxu1 %v2243_v63 }
 0x3c9   :  { %v2737_v38 = vpop.f32.mrb[16].mxu1 }
 0x3ca   :  { %v2738_v27 = vpop.f32.mrb[17].mxu1 }
 0x3cb   :  { %v2739_v26 = vadd.f32 %v2738_v27, %v2737_v38  ;;  %v2740_v8 = vpop.f32.mrb[18].mxu1 }
 0x3cc   :  { %v2741_v30 = vpop.f32.mrb[19].mxu1 }
 0x3cd   :  { %v2415_v31 = vadd.f32 %v2739_v26, %v2703_v28 }
 0x3cf   :  { %v2720_v32 = vmul.f32 -1.442695, %v2415_v31 }
 0x3d1   :  { %3171 = vpow2.f32 %v2720_v32 }
 0x3db   :  { %v3172_v33 = vpop.eup %3171 }
 0x3dc   :  { %v2423_v34 = vadd.f32 1.0, %v3172_v33 }
 0x3de   :  { %3173 = vrcp.f32 %v2423_v34 }
 0x3e8   :  { %v3174_v35 = vpop.eup %3173 }
 0x3e9   :  { %2426 = vst [vmem:[%s3464_s9] sm:$0xff] %v3174_v35 }
 0x3ea   :  { %2431 = vsyncpa [#allocation3], 1 }
 0x3eb   :  { %2432 = vsyncpa [#allocation5], 1 }

</bundles_post_ra>
